<compile_context>
chip_gen: v5e
topology: v5e:2x2
jax: 0.10.0
libtpu: 0.0.40
codegen_flags: <defaults>
</compile_context>

<pallas_src>
import functools
import math

import jax
import jax.numpy as jnp
from jax import lax
from jax.experimental import pallas as pl
from jax.experimental.pallas import tpu as pltpu

GN_GROUPS = 32        # nn.GroupNorm(32, out_channels)
GN_EPS = 1e-5         # PyTorch GroupNorm default eps
_INV_SQRT2 = 1.0 / math.sqrt(2.0)
_SQRT_2_OVER_PI = math.sqrt(2.0 / math.pi)
_GELU_C = 0.044715


def _gelu_tanh(x):
    # tanh-approx GELU: ~6 VALU ops + one EUP tanh per element (the erf-poly
    # version costs ~2x the VALU work; max deviation from exact GELU ~1e-3,
    # well inside the test tolerance).
    x3 = x * x * x
    return 0.5 * x * (1.0 + jnp.tanh(_SQRT_2_OVER_PI * (x + _GELU_C * x3)))


def _task_attention_kernel(sv_ref, fus_ref, w_ref, gm_ref, pp_ref, out_ref,
                           gram_ref, sumx_ref, shift_ref, wsc_ref,
                           *, co, cpg, total_s, tile_s, resident):
    """Grid = (B, pass, S-tile).

    sv_ref   : (1, 1, Co)            f32   GELU(Linear(GAP(stage)))  (wrapper)
    fus_ref  : (1, Cin, TS or Spad)  bf16  fus_features (tile or batch-resident)
    w_ref    : (2*Co, Cin)           bf16  [w_fe ; w_re] fused 1x1x1 conv weights
    gm_ref   : (2*Co, 2*Co)          f32   group-membership matrix
    pp_ref   : (2*Co, 3)             f32   packed [bias, gamma, beta]
    out_ref  : (1, Co, TS)           out_dtype
    gram_ref : (Cin, Cin)            f32   scratch: X X^T accumulator
    sumx_ref : (Cin, 1)              f32   scratch: per-input-channel sum
    shift_ref: (2*Co, 1)             f32   scratch: folded per-channel shift
    wsc_ref  : (2*Co, Cin)           bf16  scratch: scale-folded weights
    """
    p = pl.program_id(1)
    s = pl.program_id(2)
    f32 = jnp.float32

    if resident:
        # Batch-resident fus block: slice the current spatial tile in VMEM.
        start = pl.multiple_of(s * tile_s, 128)
        x = fus_ref[0, :, pl.ds(start, tile_s)]              # (Cin, TS) bf16
    else:
        x = fus_ref[0]                                        # (Cin, TS) bf16

    # ---------------- pass 0: Gram matrix + per-input-channel sums -----------
    # Conv-output stats are derived analytically at pass-1 init, so pass 0 is
    # just DMA + one MXU matmul with K = TS (fills the MXU) + one small reduce.
    # Zero-padded spatial columns contribute nothing here.
    @pl.when(p == 0)
    def _():
        g_tile = lax.dot_general(x, x, (((1,), (1,)), ((), ())),
                                 preferred_element_type=f32)   # (Cin, Cin)
        s_tile = jnp.sum(x.astype(f32), axis=1, keepdims=True)  # (Cin, 1)

        @pl.when(s == 0)
        def _():
            gram_ref[...] = g_tile
            sumx_ref[...] = s_tile

        @pl.when(s > 0)
        def _():
            gram_ref[...] = gram_ref[...] + g_tile
            sumx_ref[...] = sumx_ref[...] + s_tile

    # ---- pass 1, first tile: GroupNorm stats -> fold affine into weights ----
    @pl.when(jnp.logical_and(p == 1, s == 0))
    def _():
        w32 = w_ref[...].astype(f32)                           # (2Co, Cin)
        bias = pp_ref[:, 0:1]
        gamma = pp_ref[:, 1:2]
        beta = pp_ref[:, 2:3]
        s_f = float(total_s)                                   # true (unpadded) S

        # per-channel sum / sumsq of y = W x + b, from (G, sum_x):
        #   sum_y   = W.sum_x + S*b
        #   sumsq_y = diag(W G W^T) + 2 b (W.sum_x) + S*b^2
        wsum = jnp.dot(w32, sumx_ref[...], preferred_element_type=f32)   # (2Co,1)
        sum_y = wsum + s_f * bias
        wg = jnp.dot(w32, gram_ref[...], preferred_element_type=f32)     # (2Co,Cin)
        quad = jnp.sum(wg * w32, axis=1, keepdims=True)                  # (2Co,1)
        sumsq_y = quad + 2.0 * bias * wsum + s_f * bias * bias

        # combine channels of the same GroupNorm group (tiny matmul, once/batch)
        gsum = jnp.dot(gm_ref[...], sum_y, preferred_element_type=f32)   # (2Co,1)
        gsq = jnp.dot(gm_ref[...], sumsq_y, preferred_element_type=f32)  # (2Co,1)
        inv_n = 1.0 / float(cpg * total_s)
        mean = gsum * inv_n
        # one-pass variance can go slightly negative under f32 cancellation
        var = jnp.maximum(gsq * inv_n - mean * mean, 0.0)
        inv_std = lax.rsqrt(var + GN_EPS)
        scale = gamma * inv_std

        # normalized = (W x)*scale + (b - mean)*scale + beta
        shift_ref[...] = (bias - mean) * scale + beta
        wsc_ref[...] = (w32 * scale).astype(jnp.bfloat16)

    # ---------------- pass 1: conv+affine, GELU, relations, store ------------
    # NOTE: the output block index is pinned at (b,0,0) for all of pass 0 and
    # only advances during pass 1, so no uninitialized data is ever written
    # back (pass-1 s==0 fully overwrites the block before its index changes).
    @pl.when(p == 1)
    def _():
        y = jnp.dot(wsc_ref[...], x,
                    preferred_element_type=f32) + shift_ref[...]   # (2Co, TS)
        act = _gelu_tanh(y)
        fus_feat = act[:co]                                        # (Co, TS)
        p_feats = act[co:]                                         # (Co, TS)
        # relations = sigmoid(stage_vec . fus_feat) on the otherwise-idle MXU,
        # kept in f32 to avoid an extra (Co, TS) cast on the binding VALU slot.
        rel = jax.nn.sigmoid(
            jnp.dot(sv_ref[0], fus_feat, preferred_element_type=f32))  # (1, TS)
        out_ref[0] = (rel * p_feats).astype(out_ref.dtype)


def _round_up(x, m):
    return ((x + m - 1) // m) * m


def _vmem_capacity_bytes():
    try:
        cap = getattr(pltpu.get_tpu_info(), "vmem_capacity_bytes", None)
        if cap:
            return int(cap)
    except Exception:
        pass
    return 64 * 1024 * 1024   # conservative default (v7x per-core VMEM)


def task_attention(stage_feature, fus_features, params, *,
                   spatial_tile=None, fus_resident=None,
                   out_dtype=jnp.bfloat16):
    """stage_feature: (B, Cs, Ds, Hs, Ws); fus_features: (B, Cin, D, H, W).

    spatial_tile=None  -> auto-size from device VMEM capacity.
    fus_resident=None  -> auto: keep the whole per-batch fus in VMEM if it fits.
    out_dtype          -> bf16 by default (halves output HBM writes); pass
                          jnp.float32 for exact dtype parity with the module.
    """
    B, Cs, _, _, _ = stage_feature.shape
    Bf, Cin, D, H, W = fus_features.shape
    assert B == Bf
    Co = params["w_fe"].shape[0]
    assert Co % GN_GROUPS == 0, "GroupNorm(32, C) requires C % 32 == 0"
    S = D * H * W
    f32 = jnp.float32
    out_bytes = jnp.dtype(out_dtype).itemsize

    vmem_cap = _vmem_capacity_bytes()

    # ---- stage encoder hoisted to the wrapper: GAP -> Linear -> GELU (tiny) --
    gap = jnp.mean(stage_feature.astype(f32), axis=(2, 3, 4))          # (B, Cs)
    z = gap @ params["w_se"].astype(f32).T + params["b_se"].astype(f32)
    stage_vec = 0.5 * z * (1.0 + lax.erf(z * _INV_SQRT2))              # (B, Co)
    sv = stage_vec.reshape(B, 1, Co)

    # ---- fuse the two 1x1x1 convs; bf16 inputs for the MXU -------------------
    w_cat = jnp.concatenate([params["w_fe"], params["w_re"]],
                            axis=0).astype(jnp.bfloat16)               # (2Co, Cin)

    # ---- pack per-channel params: columns [bias, gamma, beta] ----------------
    pp = jnp.stack([
        jnp.concatenate([params["b_fe"], params["b_re"]]),
        jnp.concatenate([params["g_fe"], params["g_re"]]),
        jnp.concatenate([params["be_fe"], params["be_re"]]),
    ], axis=1).astype(f32)                                             # (2Co, 3)

    # ---- group-membership matrix (channel -> same-group indicator) -----------
    cpg = Co // GN_GROUPS
    gid = jnp.arange(2 * Co) // cpg
    gm = (gid[:, None] == gid[None, :]).astype(f32)                    # (2Co, 2Co)

    # ---- residency / tile sizing from VMEM capacity ---------------------------
    s128 = _round_up(S, 128)
    if fus_resident is None:
        # 2x for Pallas double-buffering of the resident block.
        fus_resident = (2 * Cin * s128 * 2) <= int(0.25 * vmem_cap)

    fixed = (2 * Co * Cin * 2            # w_cat
             + (2 * Co) * (2 * Co) * 4   # gm
             + 2 * Co * 3 * 4 + Co * 4   # pp + sv
             + Cin * Cin * 4 + Cin * 4   # gram + sumx scratch
             + 2 * Co * 4 + 2 * Co * Cin * 2)  # shift + scaled-weight scratch
    if fus_resident:
        fixed += 2 * Cin * s128 * 2

    if spatial_tile is None:
        per_col = (0 if fus_resident else 4 * Cin)   # streamed fus, double-buffered
        per_col += 6 * Cin                           # x value + f32 cast temp (pass 0)
        per_col += 3 * Co * out_bytes                # out block (x2 buffers) + cast temp
        per_col += 32 * Co                           # ~4 live f32 (2Co, ts) temps (pass 1)
        budget = max(int(0.45 * vmem_cap) - fixed, per_col * 128)
        ts = max(128, min(32768, (budget // per_col) // 128 * 128))
    else:
        ts = max(128, _round_up(int(spatial_tile), 128))
    ts = min(ts, s128)
    s_pad = _round_up(S, ts)
    n_s = s_pad // ts

    fus2 = fus_features.reshape(B, Cin, S).astype(jnp.bfloat16)
    if s_pad != S:
        # Zero padding contributes nothing to the Gram stats; padded output
        # lanes are sliced off below.
        fus2 = jnp.pad(fus2, ((0, 0), (0, 0), (0, s_pad - S)))

    kernel = functools.partial(_task_attention_kernel, co=Co, cpg=cpg,
                               total_s=S, tile_s=ts, resident=bool(fus_resident))

    fus_spec = (pl.BlockSpec((1, Cin, s_pad), lambda b, p, s: (b, 0, 0))
                if fus_resident
                else pl.BlockSpec((1, Cin, ts), lambda b, p, s: (b, 0, s)))

    # rough, advisory cost estimate
    flops = int(B * (2 * Cin * Cin * s_pad             # Gram (pass 0)
                     + 2 * (2 * Co) * Cin * s_pad      # conv (pass 1)
                     + 2 * Co * s_pad                  # relations matmul
                     + 14 * (2 * Co) * s_pad))         # GELU / affine / mul approx
    transcendentals = int(B * ((2 * Co) * s_pad + s_pad))
    bytes_accessed = int(B * (Cin * s_pad * 2 * (1 if fus_resident else 2)
                              + Co * s_pad * out_bytes) + 16 * Co * Co)

    # TODO(synk): v7x B==1 case could split the spatial axis across the two
    # TensorCores (per-core partial Gram/sum combined in a finalize step).
    out = pl.pallas_call(
        kernel,
        out_shape=jax.ShapeDtypeStruct((B, Co, s_pad), out_dtype),
        grid_spec=pltpu.PrefetchScalarGridSpec(
            num_scalar_prefetch=0,
            grid=(B, 2, n_s),   # (batch, pass, spatial tile)
            in_specs=[
                pl.BlockSpec((1, 1, Co), lambda b, p, s: (b, 0, 0)),      # stage_vec
                fus_spec,                                                 # fus
                pl.BlockSpec((2 * Co, Cin), lambda b, p, s: (0, 0)),      # fused W
                pl.BlockSpec((2 * Co, 2 * Co), lambda b, p, s: (0, 0)),   # group mat
                pl.BlockSpec((2 * Co, 3), lambda b, p, s: (0, 0)),        # packed params
            ],
            # Pass 0 never writes; park the output block at index 0 so nothing
            # is written back until pass 1 has fully overwritten each tile.
            out_specs=pl.BlockSpec((1, Co, ts), lambda b, p, s: (b, 0, p * s)),
            scratch_shapes=[
                pltpu.VMEM((Cin, Cin), f32),                # Gram accumulator
                pltpu.VMEM((Cin, 1), f32),                  # per-channel input sum
                pltpu.VMEM((2 * Co, 1), f32),               # folded shift
                pltpu.VMEM((2 * Co, Cin), jnp.bfloat16),    # scale-folded weights
            ],
        ),
        compiler_params=pltpu.CompilerParams(
            dimension_semantics=("parallel", "arbitrary", "arbitrary"),
            vmem_limit_bytes=int(0.8 * vmem_cap)),
        cost_estimate=pl.CostEstimate(flops=flops,
                                      transcendentals=transcendentals,
                                      bytes_accessed=bytes_accessed),
    )(sv, fus2, w_cat, gm, pp)

    if s_pad != S:
        out = out[:, :, :S]
    return out.reshape(B, Co, D, H, W)


# ---------------- pure-JAX reference (mirrors the PyTorch module) ------------
def _ref_gelu(x):
    return 0.5 * x * (1.0 + lax.erf(x * _INV_SQRT2))


def reference_task_attention(stage_feature, fus_features, p):
    B, Cs = stage_feature.shape[:2]
    gap = jnp.mean(stage_feature, axis=(2, 3, 4))                       # (B, Cs)
    z = gap @ p["w_se"].T + p["b_se"]                                   # (B, Co)
    stage_vec = _ref_gelu(z).reshape(B, Cs, 1, 1, 1)                    # Co == Cs

    def enc(w, b, g, be):
        y = jnp.einsum("oc,bcdhw->bodhw", w, fus_features,
                       precision="highest") + b[None, :, None, None, None]
        Bn, Co, D, H, W = y.shape
        yg = y.reshape(Bn, GN_GROUPS, Co // GN_GROUPS, D, H, W)
        mean = yg.mean(axis=(2, 3, 4, 5), keepdims=True)
        var = ((yg - mean) ** 2).mean(axis=(2, 3, 4, 5), keepdims=True)
        yn = ((yg - mean) / jnp.sqrt(var + GN_EPS)).reshape(Bn, Co, D, H, W)
        yn = yn * g[None, :, None, None, None] + be[None, :, None, None, None]
        return _ref_gelu(yn)

    fus_feat = enc(p["w_fe"], p["b_fe"], p["g_fe"], p["be_fe"])
    relations = jax.nn.sigmoid(jnp.sum(fus_feat * stage_vec, axis=1,
                                       keepdims=True))
    p_feats = enc(p["w_re"], p["b_re"], p["g_re"], p["be_re"])
    return relations * p_feats


if __name__ == "__main__":
    # Small shapes: in_channels = out_channels = 32 (GroupNorm(32, C) needs
    # C % 32 == 0 and the module's .view needs out == in), channel_in = 16.
    B, Cs, Cin, Co = 2, 32, 16, 32

    key = jax.random.PRNGKey(0)
    keys = jax.random.split(key, 13)

    params = {
        "w_se": 0.10 * jax.random.normal(keys[2], (Co, Cs), jnp.float32),
        "b_se": 0.05 * jax.random.normal(keys[3], (Co,), jnp.float32),
        "w_fe": 0.10 * jax.random.normal(keys[4], (Co, Cin), jnp.float32),
        "b_fe": 0.05 * jax.random.normal(keys[5], (Co,), jnp.float32),
        "g_fe": 1.0 + 0.10 * jax.random.normal(keys[6], (Co,), jnp.float32),
        "be_fe": 0.05 * jax.random.normal(keys[7], (Co,), jnp.float32),
        "w_re": 0.10 * jax.random.normal(keys[8], (Co, Cin), jnp.float32),
        "b_re": 0.05 * jax.random.normal(keys[9], (Co,), jnp.float32),
        "g_re": 1.0 + 0.10 * jax.random.normal(keys[10], (Co,), jnp.float32),
        "be_re": 0.05 * jax.random.normal(keys[11], (Co,), jnp.float32),
    }

    def check(out, ref, name):
        out = jax.block_until_ready(out).astype(jnp.float32)
        assert bool(jnp.all(jnp.isfinite(out))), f"{name}: non-finite output"
        ok = bool(jnp.allclose(out, ref, atol=2e-2, rtol=2e-2))
        assert ok, (f"{name}: max abs err "
                    f"{float(jnp.max(jnp.abs(out - ref)))}")

    # Case 1: S divisible by 128, forced streaming two-pass with two tiles.
    D, H, W = 4, 8, 8            # S = 256
    stage_feature = jax.random.normal(keys[0], (B, Cs, D, H, W), jnp.float32)
    fus_features = jax.random.normal(keys[1], (B, Cin, D, H, W), jnp.float32)
    ref = jax.block_until_ready(
        reference_task_attention(stage_feature, fus_features, params))

    out = task_attention(stage_feature, fus_features, params,
                         spatial_tile=128, fus_resident=False)
    assert out.shape == (B, Co, D, H, W)
    check(out, ref, "streaming")

    # Case 2: auto tile size / batch-resident fus path.
    out2 = task_attention(stage_feature, fus_features, params)
    check(out2, ref, "resident-auto")

    # Case 3: ragged spatial size (padded to a multiple of 128 in the wrapper).
    D2, H2, W2 = 3, 5, 7         # S = 105 -> padded to 128
    fus_ragged = jax.random.normal(keys[12], (B, Cin, D2, H2, W2), jnp.float32)
    ref_r = jax.block_until_ready(
        reference_task_attention(stage_feature, fus_ragged, params))
    out_r = task_attention(stage_feature, fus_ragged, params)
    assert out_r.shape == (B, Co, D2, H2, W2)
    check(out_r, ref_r, "ragged-pad")

    print("KERNEL_OK")
</pallas_src>

<mosaic_0001>
module attributes {stable_mosaic.version = 11 : i64} {
  func.func @_task_attention_kernel(%arg0: i32, %arg1: i32, %arg2: i32, %arg3: memref<1x1x32xf32, #tpu.memory_space<vmem>>, %arg4: memref<1x16x128xbf16, #tpu.memory_space<vmem>>, %arg5: memref<64x16xbf16, #tpu.memory_space<vmem>>, %arg6: memref<64x64xf32, #tpu.memory_space<vmem>>, %arg7: memref<64x3xf32, #tpu.memory_space<vmem>>, %arg8: memref<1x32x128xbf16, #tpu.memory_space<vmem>>, %arg9: memref<16x16xf32, #tpu.memory_space<vmem>>, %arg10: memref<16x1xf32, #tpu.memory_space<vmem>>, %arg11: memref<64x1xf32, #tpu.memory_space<vmem>>, %arg12: memref<64x16xbf16, #tpu.memory_space<vmem>>) attributes {dimension_semantics = [#tpu.dimension_semantics<parallel>, #tpu.dimension_semantics<arbitrary>, #tpu.dimension_semantics<arbitrary>], iteration_bounds = array<i64: 2, 2, 2>, scalar_prefetch = 0 : i64, scratch_operands = 4 : i64, tpu.core_type = #tpu.core_type<tc>, window_params = [{transform_indices = @transform_0, window_bounds = array<i64: 1, 1, 32>}, {transform_indices = @transform_1, window_bounds = array<i64: 1, 16, 128>}, {pipeline_mode = #tpu.pipeline_mode<synchronous>, transform_indices = @transform_2, window_bounds = array<i64: 64, 16>}, {pipeline_mode = #tpu.pipeline_mode<synchronous>, transform_indices = @transform_3, window_bounds = array<i64: 64, 64>}, {pipeline_mode = #tpu.pipeline_mode<synchronous>, transform_indices = @transform_4, window_bounds = array<i64: 64, 3>}, {transform_indices = @transform_5, window_bounds = array<i64: 1, 32, 128>}]} {
    %c0 = arith.constant 0 : index
    %c0_0 = arith.constant 0 : index
    %c0_1 = arith.constant 0 : index
    %0 = vector.load %arg4[%c0, %c0_0, %c0_1] : memref<1x16x128xbf16, #tpu.memory_space<vmem>>, vector<1x16x128xbf16>
    %1 = vector.shape_cast %0 : vector<1x16x128xbf16> to vector<16x128xbf16>
    %c0_i32 = arith.constant 0 : i32
    %2 = arith.cmpi eq, %arg1, %c0_i32 : i32
    %3 = arith.extui %2 : i1 to i32
    %c0_i32_2 = arith.constant 0 : i32
    %4 = arith.cmpi ne, %3, %c0_i32_2 : i32
    scf.if %4 {
      %cst = arith.constant dense<0.000000e+00> : vector<16x16xf32>
      %13 = tpu.matmul %1, %1, %cst {dimension_numbers = #tpu.dot_dimension_numbers<[1], [1], [0], [0], [0, 0, 1, 0], [], []>} : vector<16x128xbf16>, vector<16x128xbf16>, vector<16x16xf32> -> vector<16x16xf32>
      %14 = arith.extf %1 : vector<16x128xbf16> to vector<16x128xf32>
      %cst_7 = arith.constant dense<0.000000e+00> : vector<16xf32>
      %15 = vector.multi_reduction <add>, %14, %cst_7 [1] : vector<16x128xf32> to vector<16xf32>
      %16 = vector.shape_cast %15 : vector<16xf32> to vector<16x1xf32>
      %c0_i32_8 = arith.constant 0 : i32
      %17 = arith.cmpi eq, %arg2, %c0_i32_8 : i32
      %18 = arith.extui %17 : i1 to i32
      %c0_i32_9 = arith.constant 0 : i32
      %19 = arith.cmpi ne, %18, %c0_i32_9 : i32
      scf.if %19 {
        %c0_12 = arith.constant 0 : index
        %c0_13 = arith.constant 0 : index
        %23 = vector.load %arg9[%c0_12, %c0_13] : memref<16x16xf32, #tpu.memory_space<vmem>>, vector<16x16xf32>
        tpu.vector_store %arg9[%c0_12, %c0_13], %13 {strides = array<i32>} : memref<16x16xf32, #tpu.memory_space<vmem>>, vector<16x16xf32>,
        %c0_14 = arith.constant 0 : index
        %c0_15 = arith.constant 0 : index
        %24 = vector.load %arg10[%c0_14, %c0_15] : memref<16x1xf32, #tpu.memory_space<vmem>>, vector<16x1xf32>
        tpu.vector_store %arg10[%c0_14, %c0_15], %16 {strides = array<i32>} : memref<16x1xf32, #tpu.memory_space<vmem>>, vector<16x1xf32>,
      } else {
      }
      %c0_i32_10 = arith.constant 0 : i32
      %20 = arith.cmpi sgt, %arg2, %c0_i32_10 : i32
      %21 = arith.extui %20 : i1 to i32
      %c0_i32_11 = arith.constant 0 : i32
      %22 = arith.cmpi ne, %21, %c0_i32_11 : i32
      scf.if %22 {
        %c0_12 = arith.constant 0 : index
        %c0_13 = arith.constant 0 : index
        %23 = vector.load %arg9[%c0_12, %c0_13] : memref<16x16xf32, #tpu.memory_space<vmem>>, vector<16x16xf32>
        %24 = arith.addf %23, %13 : vector<16x16xf32>
        %c0_14 = arith.constant 0 : index
        %c0_15 = arith.constant 0 : index
        %25 = vector.load %arg9[%c0_14, %c0_15] : memref<16x16xf32, #tpu.memory_space<vmem>>, vector<16x16xf32>
        tpu.vector_store %arg9[%c0_14, %c0_15], %24 {strides = array<i32>} : memref<16x16xf32, #tpu.memory_space<vmem>>, vector<16x16xf32>,
        %c0_16 = arith.constant 0 : index
        %c0_17 = arith.constant 0 : index
        %26 = vector.load %arg10[%c0_16, %c0_17] : memref<16x1xf32, #tpu.memory_space<vmem>>, vector<16x1xf32>
        %27 = arith.addf %26, %16 : vector<16x1xf32>
        %c0_18 = arith.constant 0 : index
        %c0_19 = arith.constant 0 : index
        %28 = vector.load %arg10[%c0_18, %c0_19] : memref<16x1xf32, #tpu.memory_space<vmem>>, vector<16x1xf32>
        tpu.vector_store %arg10[%c0_18, %c0_19], %27 {strides = array<i32>} : memref<16x1xf32, #tpu.memory_space<vmem>>, vector<16x1xf32>,
      } else {
      }
    } else {
    }
    %c1_i32 = arith.constant 1 : i32
    %5 = arith.cmpi eq, %arg1, %c1_i32 : i32
    %c0_i32_3 = arith.constant 0 : i32
    %6 = arith.cmpi eq, %arg2, %c0_i32_3 : i32
    %7 = arith.andi %5, %6 : i1
    %8 = arith.extui %7 : i1 to i32
    %c0_i32_4 = arith.constant 0 : i32
    %9 = arith.cmpi ne, %8, %c0_i32_4 : i32
    scf.if %9 {
      %c0_7 = arith.constant 0 : index
      %c0_8 = arith.constant 0 : index
      %13 = vector.load %arg5[%c0_7, %c0_8] : memref<64x16xbf16, #tpu.memory_space<vmem>>, vector<64x16xbf16>
      %14 = arith.extf %13 : vector<64x16xbf16> to vector<64x16xf32>
      %c0_9 = arith.constant 0 : index
      %c0_10 = arith.constant 0 : index
      %15 = vector.load %arg7[%c0_9, %c0_10] : memref<64x3xf32, #tpu.memory_space<vmem>>, vector<64x1xf32>
      %c0_11 = arith.constant 0 : index
      %c1 = arith.constant 1 : index
      %16 = vector.load %arg7[%c0_11, %c1] : memref<64x3xf32, #tpu.memory_space<vmem>>, vector<64x1xf32>
      %c0_12 = arith.constant 0 : index
      %c2 = arith.constant 2 : index
      %17 = vector.load %arg7[%c0_12, %c2] : memref<64x3xf32, #tpu.memory_space<vmem>>, vector<64x1xf32>
      %c0_13 = arith.constant 0 : index
      %c0_14 = arith.constant 0 : index
      %18 = vector.load %arg10[%c0_13, %c0_14] : memref<16x1xf32, #tpu.memory_space<vmem>>, vector<16x1xf32>
      %cst = arith.constant dense<0.000000e+00> : vector<64x1xf32>
      %19 = tpu.matmul %14, %18, %cst {dimension_numbers = #tpu.dot_dimension_numbers<[1], [0], [0], [1], [0, 0, 1, 1], [], []>} : vector<64x16xf32>, vector<16x1xf32>, vector<64x1xf32> -> vector<64x1xf32>
      %cst_15 = arith.constant 2.560000e+02 : f32
      %20 = vector.broadcast %cst_15 : f32 to vector<64x1xf32>
      %21 = arith.mulf %20, %15 : vector<64x1xf32>
      %22 = arith.addf %19, %21 : vector<64x1xf32>
      %c0_16 = arith.constant 0 : index
      %c0_17 = arith.constant 0 : index
      %23 = vector.load %arg9[%c0_16, %c0_17] : memref<16x16xf32, #tpu.memory_space<vmem>>, vector<16x16xf32>
      %cst_18 = arith.constant dense<0.000000e+00> : vector<64x16xf32>
      %24 = tpu.matmul %14, %23, %cst_18 {dimension_numbers = #tpu.dot_dimension_numbers<[1], [0], [0], [1], [0, 0, 1, 1], [], []>} : vector<64x16xf32>, vector<16x16xf32>, vector<64x16xf32> -> vector<64x16xf32>
      %25 = arith.mulf %24, %14 : vector<64x16xf32>
      %cst_19 = arith.constant dense<0.000000e+00> : vector<64xf32>
      %26 = vector.multi_reduction <add>, %25, %cst_19 [1] : vector<64x16xf32> to vector<64xf32>
      %27 = vector.shape_cast %26 : vector<64xf32> to vector<64x1xf32>
      %cst_20 = arith.constant 2.000000e+00 : f32
      %28 = vector.broadcast %cst_20 : f32 to vector<64x1xf32>
      %29 = arith.mulf %28, %15 : vector<64x1xf32>
      %30 = arith.mulf %29, %19 : vector<64x1xf32>
      %31 = arith.addf %27, %30 : vector<64x1xf32>
      %cst_21 = arith.constant 2.560000e+02 : f32
      %32 = vector.broadcast %cst_21 : f32 to vector<64x1xf32>
      %33 = arith.mulf %32, %15 : vector<64x1xf32>
      %34 = arith.mulf %33, %15 : vector<64x1xf32>
      %35 = arith.addf %31, %34 : vector<64x1xf32>
      %c0_22 = arith.constant 0 : index
      %c0_23 = arith.constant 0 : index
      %36 = vector.load %arg6[%c0_22, %c0_23] : memref<64x64xf32, #tpu.memory_space<vmem>>, vector<64x64xf32>
      %cst_24 = arith.constant dense<0.000000e+00> : vector<64x1xf32>
      %37 = tpu.matmul %36, %22, %cst_24 {dimension_numbers = #tpu.dot_dimension_numbers<[1], [0], [0], [1], [0, 0, 1, 1], [], []>} : vector<64x64xf32>, vector<64x1xf32>, vector<64x1xf32> -> vector<64x1xf32>
      %c0_25 = arith.constant 0 : index
      %c0_26 = arith.constant 0 : index
      %38 = vector.load %arg6[%c0_25, %c0_26] : memref<64x64xf32, #tpu.memory_space<vmem>>, vector<64x64xf32>
      %cst_27 = arith.constant dense<0.000000e+00> : vector<64x1xf32>
      %39 = tpu.matmul %38, %35, %cst_27 {dimension_numbers = #tpu.dot_dimension_numbers<[1], [0], [0], [1], [0, 0, 1, 1], [], []>} : vector<64x64xf32>, vector<64x1xf32>, vector<64x1xf32> -> vector<64x1xf32>
      %cst_28 = arith.constant 3.906250e-03 : f32
      %40 = vector.broadcast %cst_28 : f32 to vector<64x1xf32>
      %41 = arith.mulf %37, %40 : vector<64x1xf32>
      %cst_29 = arith.constant 3.906250e-03 : f32
      %42 = vector.broadcast %cst_29 : f32 to vector<64x1xf32>
      %43 = arith.mulf %39, %42 : vector<64x1xf32>
      %44 = arith.mulf %41, %41 : vector<64x1xf32>
      %45 = arith.subf %43, %44 : vector<64x1xf32>
      %cst_30 = arith.constant 0.000000e+00 : f32
      %46 = vector.broadcast %cst_30 : f32 to vector<64x1xf32>
      %47 = arith.maximumf %45, %46 : vector<64x1xf32>
      %cst_31 = arith.constant 9.99999974E-6 : f32
      %48 = vector.broadcast %cst_31 : f32 to vector<64x1xf32>
      %49 = arith.addf %47, %48 : vector<64x1xf32>
      %50 = math.rsqrt %49 : vector<64x1xf32>
      %51 = arith.mulf %16, %50 : vector<64x1xf32>
      %52 = arith.subf %15, %41 : vector<64x1xf32>
      %53 = arith.mulf %52, %51 : vector<64x1xf32>
      %54 = arith.addf %53, %17 : vector<64x1xf32>
      %c0_32 = arith.constant 0 : index
      %c0_33 = arith.constant 0 : index
      %55 = vector.load %arg11[%c0_32, %c0_33] : memref<64x1xf32, #tpu.memory_space<vmem>>, vector<64x1xf32>
      tpu.vector_store %arg11[%c0_32, %c0_33], %54 {strides = array<i32>} : memref<64x1xf32, #tpu.memory_space<vmem>>, vector<64x1xf32>,
      %56 = vector.broadcast %51 : vector<64x1xf32> to vector<64x16xf32>
      %57 = arith.mulf %14, %56 : vector<64x16xf32>
      %58 = arith.truncf %57 : vector<64x16xf32> to vector<64x16xbf16>
      %c0_34 = arith.constant 0 : index
      %c0_35 = arith.constant 0 : index
      %59 = vector.load %arg12[%c0_34, %c0_35] : memref<64x16xbf16, #tpu.memory_space<vmem>>, vector<64x16xbf16>
      tpu.vector_store %arg12[%c0_34, %c0_35], %58 {strides = array<i32>} : memref<64x16xbf16, #tpu.memory_space<vmem>>, vector<64x16xbf16>,
    } else {
    }
    %c1_i32_5 = arith.constant 1 : i32
    %10 = arith.cmpi eq, %arg1, %c1_i32_5 : i32
    %11 = arith.extui %10 : i1 to i32
    %c0_i32_6 = arith.constant 0 : i32
    %12 = arith.cmpi ne, %11, %c0_i32_6 : i32
    scf.if %12 {
      %c0_7 = arith.constant 0 : index
      %c0_8 = arith.constant 0 : index
      %13 = vector.load %arg12[%c0_7, %c0_8] : memref<64x16xbf16, #tpu.memory_space<vmem>>, vector<64x16xbf16>
      %cst = arith.constant dense<0.000000e+00> : vector<64x128xf32>
      %14 = tpu.matmul %13, %1, %cst {dimension_numbers = #tpu.dot_dimension_numbers<[1], [0], [0], [1], [0, 0, 1, 1], [], []>} : vector<64x16xbf16>, vector<16x128xbf16>, vector<64x128xf32> -> vector<64x128xf32>
      %c0_9 = arith.constant 0 : index
      %c0_10 = arith.constant 0 : index
      %15 = vector.load %arg11[%c0_9, %c0_10] : memref<64x1xf32, #tpu.memory_space<vmem>>, vector<64x1xf32>
      %16 = vector.broadcast %15 : vector<64x1xf32> to vector<64x128xf32>
      %17 = arith.addf %14, %16 : vector<64x128xf32>
      %18 = arith.mulf %17, %17 : vector<64x128xf32>
      %19 = arith.mulf %18, %17 : vector<64x128xf32>
      %cst_11 = arith.constant 5.000000e-01 : f32
      %20 = vector.broadcast %cst_11 : f32 to vector<64x128xf32>
      %21 = arith.mulf %20, %17 : vector<64x128xf32>
      %cst_12 = arith.constant 4.471500e-02 : f32
      %22 = vector.broadcast %cst_12 : f32 to vector<64x128xf32>
      %23 = arith.mulf %22, %19 : vector<64x128xf32>
      %24 = arith.addf %17, %23 : vector<64x128xf32>
      %cst_13 = arith.constant 0.797884583 : f32
      %25 = vector.broadcast %cst_13 : f32 to vector<64x128xf32>
      %26 = arith.mulf %25, %24 : vector<64x128xf32>
      %27 = math.tanh %26 : vector<64x128xf32>
      %cst_14 = arith.constant 1.000000e+00 : f32
      %28 = vector.broadcast %cst_14 : f32 to vector<64x128xf32>
      %29 = arith.addf %28, %27 : vector<64x128xf32>
      %30 = arith.mulf %21, %29 : vector<64x128xf32>
      %31 = vector.extract_strided_slice %30 {offsets = [0, 0], sizes = [32, 128], strides = [1, 1]} : vector<64x128xf32> to vector<32x128xf32>
      %32 = vector.extract_strided_slice %30 {offsets = [32, 0], sizes = [32, 128], strides = [1, 1]} : vector<64x128xf32> to vector<32x128xf32>
      %c0_15 = arith.constant 0 : index
      %c0_16 = arith.constant 0 : index
      %c0_17 = arith.constant 0 : index
      %33 = vector.load %arg3[%c0_15, %c0_16, %c0_17] : memref<1x1x32xf32, #tpu.memory_space<vmem>>, vector<1x1x32xf32>
      %34 = vector.shape_cast %33 : vector<1x1x32xf32> to vector<1x32xf32>
      %cst_18 = arith.constant dense<0.000000e+00> : vector<1x128xf32>
      %35 = tpu.matmul %34, %31, %cst_18 {dimension_numbers = #tpu.dot_dimension_numbers<[1], [0], [0], [1], [0, 0, 1, 1], [], []>} : vector<1x32xf32>, vector<32x128xf32>, vector<1x128xf32> -> vector<1x128xf32>
      %36 = arith.negf %35 : vector<1x128xf32>
      %37 = math.exp %36 : vector<1x128xf32>
      %cst_19 = arith.constant 1.000000e+00 : f32
      %38 = vector.broadcast %cst_19 : f32 to vector<1x128xf32>
      %39 = arith.addf %38, %37 : vector<1x128xf32>
      %40 = arith.divf %38, %39 : vector<1x128xf32>
      %41 = vector.broadcast %40 : vector<1x128xf32> to vector<32x128xf32>
      %42 = arith.mulf %41, %32 : vector<32x128xf32>
      %43 = arith.truncf %42 : vector<32x128xf32> to vector<32x128xbf16>
      %c0_20 = arith.constant 0 : index
      %c0_21 = arith.constant 0 : index
      %c0_22 = arith.constant 0 : index
      %44 = vector.load %arg8[%c0_20, %c0_21, %c0_22] : memref<1x32x128xbf16, #tpu.memory_space<vmem>>, vector<1x32x128xbf16>
      %45 = vector.shape_cast %44 : vector<1x32x128xbf16> to vector<32x128xbf16>
      %46 = vector.shape_cast %43 : vector<32x128xbf16> to vector<1x32x128xbf16>
      tpu.vector_store %arg8[%c0_20, %c0_21, %c0_22], %46 {strides = array<i32>} : memref<1x32x128xbf16, #tpu.memory_space<vmem>>, vector<1x32x128xbf16>,
    } else {
    }
    return
  }
  func.func @transform_0(%arg0: i32, %arg1: i32, %arg2: i32) -> (i32, i32, i32) {
    %c0_i32 = arith.constant 0 : i32
    %c0_i32_0 = arith.constant 0 : i32
    %c0_i32_1 = arith.constant 0 : i32
    return %arg0, %c0_i32, %c0_i32_0 : i32, i32, i32
  }
  func.func @transform_1(%arg0: i32, %arg1: i32, %arg2: i32) -> (i32, i32, i32) {
    %c0_i32 = arith.constant 0 : i32
    %c0_i32_0 = arith.constant 0 : i32
    return %arg0, %c0_i32, %arg2 : i32, i32, i32
  }
  func.func @transform_2(%arg0: i32, %arg1: i32, %arg2: i32) -> (i32, i32) {
    %c0_i32 = arith.constant 0 : i32
    %c0_i32_0 = arith.constant 0 : i32
    %c0_i32_1 = arith.constant 0 : i32
    return %c0_i32, %c0_i32_0 : i32, i32
  }
  func.func @transform_3(%arg0: i32, %arg1: i32, %arg2: i32) -> (i32, i32) {
    %c0_i32 = arith.constant 0 : i32
    %c0_i32_0 = arith.constant 0 : i32
    %c0_i32_1 = arith.constant 0 : i32
    return %c0_i32, %c0_i32_0 : i32, i32
  }
  func.func @transform_4(%arg0: i32, %arg1: i32, %arg2: i32) -> (i32, i32) {
    %c0_i32 = arith.constant 0 : i32
    %c0_i32_0 = arith.constant 0 : i32
    %c0_i32_1 = arith.constant 0 : i32
    return %c0_i32, %c0_i32_0 : i32, i32
  }
  func.func @transform_5(%arg0: i32, %arg1: i32, %arg2: i32) -> (i32, i32, i32) {
    %0 = arith.muli %arg1, %arg2 : i32
    %c0_i32 = arith.constant 0 : i32
    %c0_i32_0 = arith.constant 0 : i32
    return %arg0, %c0_i32, %0 : i32, i32, i32
  }
}

</mosaic_0001>

<bundles_post_ra>
// kernel: tpu_custom_call.1
= control target key start
LH: loop header
LB: loop body
LE: loop exit
PB: predicated region body
PF: predicated region fallthrough
CT: control target
= control target key end

     0   :  { %s2413_s0 = inlined_call_operand.vmem [shape: f32[2,1,32], index: 0, kind: input, shape index: {}]   ;;  %s2414_s1 = inlined_call_operand.vmem [shape: bf16[2,16,256], index: 1, kind: input, shape index: {}]   ;;  %s2415_s2 = inlined_call_operand.vmem [shape: bf16[64,16], index: 2, kind: input, shape index: {}]   ;;  %s2416_s3 = inlined_call_operand.vmem [shape: f32[64,64], index: 3, kind: input, shape index: {}]   ;;  %s2417_s4 = inlined_call_operand.vmem [shape: f32[64,3], index: 4, kind: input, shape index: {}]   ;;  %s2418_s5 = inlined_call_operand.hbm [shape: bf16[2,32,256], index: 5, kind: output, shape index: {}]  }
   0x1   :  { %2425 = sst [smem:[#allocation12_spill]] %s2413_s0 }
   0x2   :  { %2426 = sst [smem:[#allocation13_spill]] %s2414_s1 }
   0x3   :  { %2427 = sst [smem:[#allocation14_spill]] %s2415_s2 }
   0x4   :  { %2428 = sst [smem:[#allocation15_spill]] %s2416_s3 }
   0x5   :  { %2429 = sst [smem:[#allocation16_spill]] %s2417_s4 }
   0x6   :  { %2430 = sst [smem:[#allocation17_spill]] %s2418_s5 }
   0x7   :  { %10 = vsyncpa [#allocation8], 0 }
   0x8   :  { %12 = vsyncpa [#allocation8 + $0x1], 0  ;;  %s1850_s18 = smov 0   ;;  %s1852_s19 = smov 0  }
   0x9   :  { %s1854_s20 = smov 0   ;;  %s1856_s21 = smov 0  }
   0xa   :  { %s1858_s22 = smov 0   ;;  %s1860_s23 = smov 0  }
   0xb   :  { %s1862_s24 = smov 0   ;;  %s1864_s25 = smov 0  }
   0xc   :  { %s1866_s26 = smov 0   ;;  %s1868_s27 = smov 0  }
   0xd   :  { %s1870_s28 = smov 0   ;;  %s1872_s29 = smov 0  }
   0xe LB: > { %2431 = sst [smem:[#allocation10_spill]] %s1802_s27  ;;  %s1411_s30 = sadd.s32 4294967295, %s1810_s29   ;;  %s1810_s29 = sphi %s1872_s29, %s18_s29   ;;  %s1806_s28 = sphi %s1870_s28, %s2454_s28   ;;  %s1802_s27 = sphi %s1868_s27, %s2445_s27   ;;  %s1798_s26 = sphi %s1866_s26, %s2453_s26   ;;  %s1794_s25 = sphi %s1864_s25, %s2452_s25   ;;  %s1790_s24 = sphi %s1862_s24, %s2444_s24   ;;  %s1786_s23 = sphi %s1860_s23, %s2451_s23   ;;  %s1782_s22 = sphi %s1858_s22, %s2450_s22   ;;  %s1778_s21 = sphi %s1856_s21, %s2449_s21   ;;  %s1774_s20 = sphi %s1854_s20, %s2448_s20   ;;  %s1770_s19 = sphi %s1852_s19, %s2447_s19   ;;  %s1766_s18 = sphi %s1850_s18, %s2446_s18  }
   0xf   : > { %s1412_s6 = sadd.s32 4294967294, %s1810_s29   ;;  %s30_s7 = sadd.s32 1, %s1798_s26 }
  0x10   : > { %p31_p0 = scmp.ge.s32.totalorder %s30_s7, 2  ;;  %s33_s8 = sadd.s32 1, %s1802_s27 }
  0x11   : > { %s37_s9 = sadd.s32 1, %s1806_s28  ;;  %p79_p1 = scmp.ne.s32.totalorder %s1782_s22, %s1778_s21 }
  0x12   : > { %s2456_s7 = smov (%p31_p0, %s30_s7), 0  ;;  %s2458_s8 = smov (!%p31_p0, %s33_s8), %s1802_s27 }
  0x13   : > { %s72_s10 = sadd.s32 1, %s1782_s22  ;;  %p80_p2 = scmp.eq.s32.totalorder %s1810_s29, 0 }
  0x14   : > { %p35_p3 = scmp.ge.s32.totalorder %s2458_s8, 2  ;;  %s68_s11 = ssub.s32 %s1798_s26, %s2456_s7 }
  0x15   : > { %p1924_p4 = por %p80_p2, %p79_p1  ;;  %s158_s13 = smul.u32 %s1798_s26, %s1802_s27 }
  0x16   : > { %s2460_s8 = smov (%p35_p3, %s2458_s8), 0  ;;  %s2462_s9 = smov (!%p35_p3, %s37_s9), %s1806_s28 }
  0x17   : > { %2433 = sst [smem:[#allocation11_spill]] %s2460_s8  ;;  %s159_s14 = smul.u32 %s2460_s8, %s2456_s7 }
  0x18   : > { %p175_p5 = scmp.ne.s32.totalorder %s1774_s20, %s1770_s19  ;;  %p39_p6 = scmp.ge.s32.totalorder %s2462_s9, 2 }
  0x19   : > { %p176_p7 = scmp.eq.s32.totalorder %s1411_s30, 7  ;;  %s161_s15 = ssub.s32 %s158_s13, %s159_s14 }
  0x1a   : > { %p181_p8 = scmp.ne.s32.totalorder %s1770_s19, %s1766_s18  ;;  %s2464_s9 = smov (%p39_p6, %s2462_s9), 0 }
  0x1b   : > { %p1941_p9 = por %p176_p7, %p175_p5  ;;  %p182_p10 = scmp.eq.s32.totalorder %s1412_s6, 7 }
  0x1c   : > { %s67_s17 = ssub.s32 %s1806_s28, %s2464_s9  ;;  %s165_s27 = sadd.s32 1, %s1774_s20 }
  0x1d   : > { %s69_s5 = sor.u32 %s68_s11, %s67_s17  ;;  %s162_s3 = sor.u32 %s161_s15, %s67_s17 }
  0x1e   : > { %p70_p11 = scmp.eq.s32.totalorder %s69_s5, 0  ;;  %p163_p12 = scmp.eq.s32.totalorder %s162_s3, 0 }
  0x1f   : > { %p1948_p13 = por %p182_p10, %p181_p8  ;;  %p1414_p0 = scmp.ge.s32.totalorder %s1810_s29, 8 }
  0x20   : > { %s1953_s30 = scalar_select %p70_p11, %s1782_s22, %s72_s10  }
  0x21   : > { %s1956_s13 = scalar_select %p163_p12, %s1774_s20, %s165_s27  }
  0x22   : > { %207 = sbr.rel (%p1414_p0) target bundleno = 51 (0x33), region = 28 }
  0x27   : > { %216 = sbr.rel (!%p1924_p4) target bundleno = 51 (0x33), region = 36  ;;  %s218_s6 = sand.u32 (%p1924_p4), 1, %s1782_s22  }
  0x28   : > { %s1416_s5 = sshll.u32 (%p1924_p4), %s1806_s28, 2  ;;  %s1415_s3 = sshll.u32 (%p1924_p4), %s218_s6, 3 }
  0x29   : > { %s222_s11 = sadd.s32 (%p1924_p4), %s1798_s26, %s1416_s5  ;;  %s2436_s1 = sld [smem:[#allocation13_spill]] (%p1924_p4) }
  0x2a   : > { %s1417_s14 = sshll.u32 (%p1924_p4), %s222_s11, 2  ;;  %s220_s27 = scalar_lea.vmem (%p1924_p4), [#allocation6], %s1415_s3 }
  0x2f   : > { %s224_s10 = scalar_lea.vmem %s2436_s1, %s1417_s14 }
  0x30   : > { %v241_v0 = vld [vmem:[%s224_s10] sm:$0xf]  ;;  %v243_v1 = vld [vmem:[%s224_s10 + $0x8] sm:$0xf] }
  0x31   : > { %242 = vst [vmem:[%s220_s27] sm:$0xf] %v241_v0 }
  0x32   : > { %244 = vst [vmem:[%s220_s27 + $0x4] sm:$0xf] %v243_v1 }
  0x33 PF: > { %p1418_p1 = scmp.ge.s32.totalorder %s1810_s29, 1  ;;  %p271_p2 = scmp.lt.s32.totalorder %s1810_s29, 9 }
  0x35   : > { %p272_p3 = pnand %p1418_p1, %p271_p2 }
  0x36   : > { %s278_s12 = sand.u32 (!%p272_p3), 1, %s1778_s21   ;;  %s2423_s6 = sand.u32 (!%p272_p3), 1, %s1770_s19  }
  0x37   : > { %275 = sbr.rel (%p272_p3) target bundleno = 1387 (0x56b), region = 77  ;;  %s1419_s5 = sshll.u32 (!%p272_p3), %s278_s12, 3 }
  0x38   : > { %s1420_s3 = sshll.u32 (!%p272_p3), %s2423_s6, 4  ;;  %p308_p4 = scmp.lt.s32.totalorder (!%p272_p3), %s1794_s25, 1 }
  0x39   : > { %s280_s11 = scalar_lea.vmem (!%p272_p3), [#allocation6], %s1419_s5  ;;  %s2437_s0 = sld [smem:[#allocation12_spill]] (!%p272_p3) }
  0x3a   : > { %s1985_s10 = scalar_lea.vmem (!%p272_p3), [#allocation7], %s1420_s3  ;;  %p1421_p5 = scmp.ne.s32.totalorder (!%p272_p3), %s1790_s24, 0 }
  0x3c   : > { %v313_v2 = vld [vmem:[%s280_s11] sm:$0xff]   ;;  %s1979_s14 = scalar_select %p308_p4, %s1794_s25, 1 }
  0x3d   : > { %v1974_v3 = vld [vmem:[%s280_s11] sm:$0xf]  ;;  %v1976_v5 = vld [vmem:[%s280_s11] sm:$0xf0]  ;;  %318 = sbr.rel (%p1421_p5) target bundleno = 228 (0xe4), region = 85  ;;  %p1426_p6 = scmp.ne.s32.totalorder (!%p1421_p5), %s1786_s23, 0 }
  0x3e   : > { %v1424_v4 = vld [vmem:[%s280_s11] sm:$0xf]  ;;  %v1493_v6 = vld [vmem:[%s280_s11] sm:$0xf0] }
  0x3f   : > { %s310_s21 = scalar_lea.vmem %s2437_s0, %s1979_s14 }
  0x42   : > { %v1425_v7 = vor.u32 %v1493_v6, %v1424_v4  ;;  %v339_v8 = vunpack.c.l.bf16 %v313_v2  ;;  %v340_v9 = vunpack.c.h.bf16 %v313_v2 }
  0x44   : > { %332 = vmatpush.bf16.xpose.msra.mxu0 %v1425_v7  ;;  %341 = vadd.xlane.f32.xlu0 %v339_v8 }
  0x4b   : > { %333 = vmatmul.bf16.vlgmr.msra.gmra.mxu0 %v1425_v7 }
  0x4c   : > { %343 = vadd.xlane.f32.xlu0 %v340_v9 }
  0xb7   : > { %v342_v10 = vpop.xlane.xlu0 %341 }
  0xbf   : > { %v344_v11 = vpop.xlane.xlu0 %343 }
  0xc8   : > { %v334_v12 = vpop.f32.mrf.mxu0 }
  0xcc   : > { %348 = sbr.rel (%p1426_p6) target bundleno = 214 (0xd6), region = 89 }
  0xd0   : > { %v336_v13 = vpop.f32.mrf.mxu0 }
  0xd1   : > { %vm349_vm0 = vcmask 130048   ;;  %vm352_vm1 = vcmask 7168  }
  0xd2   : > { %350 = vst.msk [vmem:[#allocation2] sm:$0xff] %vm349_vm0, %v334_v12 }
  0xd3   : > { %351 = vst.msk [vmem:[#allocation2 + $0x8] sm:$0xff] %vm349_vm0, %v336_v13 }
  0xd4   : > { %353 = vst.msk [vmem:[#allocation3] sm:$0xff] %vm352_vm1, %v342_v10 }
  0xd5   : > { %354 = vst.msk [vmem:[#allocation3 + $0x8] sm:$0xff] %vm352_vm1, %v344_v11 }
  0xd6 PF: > { %p1427_p7 = scmp.le.s32.totalorder %s1786_s23, 0 }
  0xd8   : > { %358 = sbr.rel (%p1427_p7) target bundleno = 228 (0xe4), region = 93 }
  0xdd   : > { %v359_v14 = vld [vmem:[#allocation2] sm:$0xff]  ;;  %vm363_vm2 = vcmask 130048   ;;  %v360_v15 = vld [vmem:[#allocation2 + $0x8] sm:$0xff]  ;;  %v366_v16 = vld [vmem:[#allocation3] sm:$0xff]  ;;  %vm370_vm3 = vcmask 7168  }
  0xde   : > { %v361_v17 = vadd.f32 %v359_v14, %v334_v12  ;;  %v362_v18 = vadd.f32 %v360_v15, %v336_v13  ;;  %v368_v19 = vadd.f32 %v366_v16, %v342_v10  ;;  %v367_v20 = vld [vmem:[#allocation3 + $0x8] sm:$0xff] }
  0xdf   : > { %v369_v21 = vadd.f32 %v367_v20, %v344_v11 }
  0xe0   : > { %364 = vst.msk [vmem:[#allocation2] sm:$0xff] %vm363_vm2, %v361_v17 }
  0xe1   : > { %365 = vst.msk [vmem:[#allocation2 + $0x8] sm:$0xff] %vm363_vm2, %v362_v18 }
  0xe2   : > { %371 = vst.msk [vmem:[#allocation3] sm:$0xff] %vm370_vm3, %v368_v19 }
  0xe3   : > { %372 = vst.msk [vmem:[#allocation3 + $0x8] sm:$0xff] %vm370_vm3, %v369_v21 }
  0xe4 PF: > { %p373_p8 = scmp.eq.s32.totalorder %s1790_s24, 1  ;;  %p374_p10 = scmp.eq.s32.totalorder %s1786_s23, 0 }
  0xe6   : > { %p375_p11 = pnand %p374_p10, %p373_p8 }
  0xe7   : > { %s2438_s2 = sld [smem:[#allocation14_spill]] (!%p375_p11)  ;;  %s1812_s12 = smov (!%p375_p11), 126  }
  0xe8   : > { %378 = sbr.rel (%p375_p11) target bundleno = 1026 (0x402), region = 97  ;;  %s2439_s4 = sld [smem:[#allocation16_spill]] (!%p375_p11) }
  0xe9   : > { %s2440_s15 = sld [smem:[#allocation15_spill]] (!%p375_p11)  ;;  %s1813_s5 = smov (!%p375_p11), 1  }
  0xea   : > { %s1815_s3 = smov (!%p375_p11), 127  }
  0xed   : > { %v488_v22 = vld [vmem:[#allocation2 + $0x8] sm:$0xff]  ;;  %v487_v23 = vld [vmem:[#allocation2] sm:$0xff]  ;;  %vm405_vm4 = vcmask 130048   ;;  %v404_v29 = vld [vmem:[#allocation3 + $0x8] sm:$0xff]  ;;  %vm610_vm5 = vcmask 523264  }
  0xee   : > { %v1499_v24 = vld [vmem:[%s2438_s2] sm:$0xff]   ;;  %503 = vmatpush.msra.mxu1 %v488_v22  ;;  %v1524_v27 = vld [vmem:[%s2438_s2 + $0x8] sm:$0xff]   ;;  %v403_v30 = vld [vmem:[#allocation3] sm:$0xff]  ;;  %444 = vmatpush.msra.mxu0 %v404_v29 }
  0xef   : > { %v1995_v25 = vunpack.c.l.bf16 %v1499_v24  ;;  %v1999_v26 = vunpack.c.h.bf16 %v1499_v24  ;;  %v2006_v28 = vunpack.c.l.bf16 %v1524_v27  ;;  %v2010_v31 = vunpack.c.h.bf16 %v1524_v27  ;;  %v1525_v32 = vld [vmem:[%s2438_s2 + $0x10] sm:$0xff]   ;;  %v1526_v35 = vld [vmem:[%s2438_s2 + $0x18] sm:$0xff]   ;;  %v2092_v8 = vld [vmem:[%s2439_s4 + $0x28] sm:$0xff] }
  0xf0   : > { %504 = vmatpush.msra.mxu1 %v487_v23  ;;  %445 = vmatpush.msra.mxu0 %v403_v30  ;;  %v2019_v33 = vunpack.c.l.bf16 %v1525_v32  ;;  %v2025_v34 = vunpack.c.h.bf16 %v1525_v32  ;;  %v2034_v36 = vunpack.c.l.bf16 %v1526_v35  ;;  %v2040_v37 = vunpack.c.h.bf16 %v1526_v35  ;;  %v2081_v4 = vld [vmem:[%s2439_s4 + $0x30] sm:$0xff]  ;;  %v2086_v6 = vld [vmem:[%s2439_s4 + $0x38] sm:$0xff]  ;;  %v2101_v11 = vld [vmem:[%s2439_s4 + $0x20] sm:$0xff] }
  0xf1   : > { %1436 = vmatmul.msk.f32.vlgmr.msra.gmra.mxu1 %vm405_vm4, %v1995_v25  ;;  %1428 = vmatmul.msk.f32.vlgmr.msra.gmra.mxu0 %vm405_vm4, %v1995_v25  ;;  %v478_v9 = vmul.f32 256.0, %v2086_v6  ;;  %v2096_v10 = vmul.f32 256.0, %v2081_v4  ;;  %v2105_v13 = vmul.f32 256.0, %v2092_v8  ;;  %v2110_v14 = vld [vmem:[%s2439_s4 + $0x18] sm:$0xff]  ;;  %v2115_v18 = vmul.f32 256.0, %v2101_v11  ;;  %v2120_v19 = vld [vmem:[%s2439_s4 + $0x10] sm:$0xff] }
  0xf2   : > { %v474_v21 = vmul.f32 256.0, %v2110_v14  ;;  %v2128_v22 = vld [vmem:[%s2439_s4 + $0x8] sm:$0xff]  ;;  %v473_v24 = vmul.f32 256.0, %v2120_v19  ;;  %v2136_v27 = vld [vmem:[%s2439_s4] sm:$0xff] }
  0xf3   : > { %v2139_v30 = vmul.f32 256.0, %v2128_v22  ;;  %v2143_v35 = vmul.f32 256.0, %v2136_v27 }
  0xf9   : > { %1437 = vmatmul.msk.f32.gmra.mxu1 %vm405_vm4, %v1999_v26  ;;  %1429 = vmatmul.msk.f32.gmra.mxu0 %vm405_vm4, %v1999_v26 }
 0x101   : > { %1438 = vmatmul.msk.f32.gmra.mxu1 %vm405_vm4, %v2006_v28  ;;  %1430 = vmatmul.msk.f32.gmra.mxu0 %vm405_vm4, %v2006_v28 }
 0x109   : > { %1439 = vmatmul.msk.f32.gmra.mxu1 %vm405_vm4, %v2010_v31  ;;  %1431 = vmatmul.msk.f32.gmra.mxu0 %vm405_vm4, %v2010_v31 }
 0x111   : > { %1440 = vmatmul.msk.f32.gmra.mxu1 %vm405_vm4, %v2019_v33  ;;  %1432 = vmatmul.msk.f32.gmra.mxu0 %vm405_vm4, %v2019_v33 }
 0x119   : > { %1441 = vmatmul.msk.f32.gmra.mxu1 %vm405_vm4, %v2025_v34  ;;  %1433 = vmatmul.msk.f32.gmra.mxu0 %vm405_vm4, %v2025_v34 }
 0x121   : > { %1442 = vmatmul.msk.f32.gmra.mxu1 %vm405_vm4, %v2034_v36  ;;  %1434 = vmatmul.msk.f32.gmra.mxu0 %vm405_vm4, %v2034_v36 }
 0x129   : > { %1443 = vmatmul.msk.f32.gmra.mxu1 %vm405_vm4, %v2040_v37  ;;  %1435 = vmatmul.msk.f32.gmra.mxu0 %vm405_vm4, %v2040_v37 }
 0x16e   : > { %v506_v38 = vpop.f32.mrf.mxu1  ;;  %v2052_v41 = vpop.f32.mrf.mxu0 }
 0x16f   : > { %v530_v58 = vmul.f32 %v1995_v25, %v506_v38 }
 0x171   : > { %v538_v61 = vsel %vm405_vm4, %v530_v58, 0.0 }
 0x176   : > { %v509_v39 = vpop.f32.mrf.mxu1  ;;  %v2056_v45 = vpop.f32.mrf.mxu0 }
 0x177   : > { %v531_v7 = vmul.f32 %v1999_v26, %v509_v39  ;;  %v480_v38 = vadd.f32 %v2139_v30, %v2056_v45  ;;  %v479_v39 = vadd.f32 %v2143_v35, %v2052_v41 }
 0x179   : > { %v541_v12 = vsel %vm405_vm4, %v531_v7, 0.0 }
 0x17e   : > { %v512_v40 = vpop.f32.mrf.mxu1  ;;  %v2060_v49 = vpop.f32.mrf.mxu0 }
 0x17f   : > { %v532_v46 = vmul.f32 %v2006_v28, %v512_v40  ;;  %v481_v32 = vadd.f32 %v473_v24, %v2060_v49  ;;  %v565_v40 = vmul.f32 2.0, %v2110_v14 }
 0x181   : > { %v544_v48 = vsel %vm405_vm4, %v532_v46, 0.0 }
 0x186   : > { %v515_v42 = vpop.f32.mrf.mxu1  ;;  %v456_v53 = vpop.f32.mrf.mxu0 }
 0x187   : > { %v533_v43 = vmul.f32 %v2010_v31, %v515_v42  ;;  %v482_v29 = vadd.f32 %v474_v21, %v456_v53  ;;  %v573_v42 = vmul.f32 %v565_v40, %v456_v53  ;;  %v569_v53 = vmul.f32 2.0, %v2086_v6 }
 0x188   : > { %v562_v40 = vmul.f32 2.0, %v2136_v27 }
 0x189   : > { %v547_v44 = vsel %vm405_vm4, %v533_v43, 0.0  ;;  %v589_v43 = vmul.f32 %v474_v21, %v2110_v14 }
 0x18a   : > { %548 = vadd.xlane.f32.xlu2 %v547_v44 }
 0x18e   : > { %v518_v47 = vpop.f32.mrf.mxu1  ;;  %v2066_v57 = vpop.f32.mrf.mxu0 }
 0x18f   : > { %v534_v54 = vmul.f32 %v2019_v33, %v518_v47  ;;  %v483_v23 = vadd.f32 %v2115_v18, %v2066_v57  ;;  %v564_v47 = vmul.f32 2.0, %v2120_v19 }
 0x191   : > { %v550_v56 = vsel %vm405_vm4, %v534_v54, 0.0 }
 0x192   : > { %545 = vadd.xlane.f32.xlu2 %v544_v48 }
 0x196   : > { %v521_v50 = vpop.f32.mrf.mxu1  ;;  %v2072_v63 = vpop.f32.mrf.mxu0 }
 0x197   : > { %v535_v51 = vmul.f32 %v2025_v34, %v521_v50  ;;  %v484_v20 = vadd.f32 %v2105_v13, %v2072_v63  ;;  %v572_v50 = vmul.f32 %v564_v47, %v2060_v49  ;;  %v603_v49 = vld [vmem:[%s2440_s15 + $0x8] sm:$0xff] }
 0x199   : > { %v553_v52 = vsel %vm405_vm4, %v535_v51, 0.0  ;;  %v588_v51 = vmul.f32 %v473_v24, %v2120_v19 }
 0x19a   : > { %554 = vadd.xlane.f32.xlu1 %v553_v52 }
 0x19e   : > { %v524_v55 = vpop.f32.mrf.mxu1  ;;  %v2076_v2 = vpop.f32.mrf.mxu0 }
 0x19f   : > { %v536_v0 = vmul.f32 %v2034_v36, %v524_v55  ;;  %v485_v17 = vadd.f32 %v2096_v10, %v2076_v2 }
 0x1a1   : > { %v556_v1 = vsel %vm405_vm4, %v536_v0, 0.0 }
 0x1a2   : > { %551 = vadd.xlane.f32.xlu1 %v550_v56  ;;  %v602_v56 = vld [vmem:[%s2440_s15] sm:$0xff] }
 0x1a6   : > { %v527_v59 = vpop.f32.mrf.mxu1  ;;  %v468_v15 = vpop.f32.mrf.mxu0 }
 0x1a7   : > { %v537_v60 = vmul.f32 %v2040_v37, %v527_v59  ;;  %v486_v16 = vadd.f32 %v478_v9, %v468_v15  ;;  %v577_v59 = vmul.f32 %v569_v53, %v468_v15  ;;  %v604_v15 = vld [vmem:[%s2440_s15 + $0x10] sm:$0xff] }
 0x1a9   : > { %v559_v62 = vsel %vm405_vm4, %v537_v60, 0.0  ;;  %643 = vmatpush.msra.mxu2 %v486_v16  ;;  %v593_v60 = vmul.f32 %v478_v9, %v2086_v6 }
 0x1aa   : > { %539 = vadd.xlane.f32.xlu1 %v538_v61  ;;  %560 = vadd.xlane.f32.xlu0 %v559_v62  ;;  %v567_v62 = vmul.f32 2.0, %v2092_v8 }
 0x1ab   : > { %644 = vmatpush.msra.mxu2 %v485_v17  ;;  %943 = vrot.lane.b32.xlu2 %v2128_v22, %s1812_s12 }
 0x1ac   : > { %v575_v16 = vmul.f32 %v567_v62, %v2072_v63  ;;  %v591_v63 = vmul.f32 %v2105_v13, %v2092_v8 }
 0x1ad   : > { %645 = vmatpush.msra.mxu2 %v484_v20  ;;  %v592_v20 = vmul.f32 %v2096_v10, %v2081_v4 }
 0x1af   : > { %646 = vmatpush.msra.mxu2 %v483_v23 }
 0x1b1   : > { %647 = vmatpush.msra.mxu2 %v482_v29 }
 0x1b2   : > { %557 = vadd.xlane.f32.xlu0 %v556_v1  ;;  %v568_v1 = vmul.f32 2.0, %v2081_v4 }
 0x1b3   : > { %648 = vmatpush.msra.mxu2 %v481_v32  ;;  %v563_v32 = vmul.f32 2.0, %v2128_v22 }
 0x1b4   : > { %v576_v9 = vmul.f32 %v568_v1, %v2076_v2  ;;  %v590_v2 = vmul.f32 %v2115_v18, %v2101_v11  ;;  %v587_v18 = vmul.f32 %v2139_v30, %v2128_v22  ;;  %v608_v30 = vld [vmem:[%s2440_s15 + $0x30] sm:$0xff] }
 0x1b5   : > { %649 = vmatpush.msra.mxu2 %v480_v38 }
 0x1b7   : > { %650 = vmatpush.msra.mxu2 %v479_v39 }
 0x1b8   : > { %1444 = vmatmul.msk.f32.vlgmr.msra.gmra.mxu2 %vm610_vm5, %v602_v56 }
 0x1ba   : > { %542 = vadd.xlane.f32.xlu0 %v541_v12  ;;  %v566_v12 = vmul.f32 2.0, %v2101_v11 }
 0x1bc   : > { %v574_v23 = vmul.f32 %v566_v12, %v2066_v57  ;;  %v605_v57 = vld [vmem:[%s2440_s15 + $0x18] sm:$0xff] }
 0x1c0   : > { %1445 = vmatmul.msk.f32.gmra.mxu2 %vm610_vm5, %v603_v49 }
 0x1c3   : > { %945 = vrot.lane.b32.xlu1 %v2120_v19, %s1812_s12 }
 0x1c8   : > { %1446 = vmatmul.msk.f32.gmra.mxu2 %vm610_vm5, %v604_v15 }
 0x1ce   : > { %941 = vrot.lane.b32.xlu0 %v2136_v27, %s1812_s12 }
 0x1d0   : > { %1447 = vmatmul.msk.f32.gmra.mxu2 %vm610_vm5, %v605_v57 }
 0x1fd   : > { %v549_v44 = vpop.xlane.xlu2 %548 }
 0x1fe   : > { %v581_v46 = vadd.f32 %v573_v42, %v549_v44  ;;  %v571_v42 = vmul.f32 %v563_v32, %v2056_v45 }
 0x200   : > { %v597_v48 = vadd.f32 %v589_v43, %v581_v46  ;;  %v570_v46 = vmul.f32 %v562_v40, %v2052_v41  ;;  %v607_v41 = vld [vmem:[%s2440_s15 + $0x28] sm:$0xff] }
 0x205   : > { %v546_v52 = vpop.xlane.xlu2 %545 }
 0x206   : > { %v580_v54 = vadd.f32 %v572_v50, %v546_v52  ;;  %v606_v52 = vld [vmem:[%s2440_s15 + $0x20] sm:$0xff] }
 0x207   : > { %1448 = vmatmul.msk.f32.gmra.mxu2 %vm610_vm5, %v606_v52 }
 0x208   : > { %v596_v55 = vadd.f32 %v588_v51, %v580_v54  ;;  %v586_v51 = vmul.f32 %v2143_v35, %v2136_v27  ;;  %v609_v35 = vld [vmem:[%s2440_s15 + $0x38] sm:$0xff] }
 0x20d   : > { %v555_v58 = vpop.xlane.xlu1 %554 }
 0x20e   : > { %v583_v24 = vadd.f32 %v575_v16, %v555_v58 }
 0x20f   : > { %1449 = vmatmul.msk.f32.gmra.mxu2 %vm610_vm5, %v607_v41 }
 0x210   : > { %v599_v10 = vadd.f32 %v591_v63, %v583_v24 }
 0x215   : > { %v552_v17 = vpop.xlane.xlu1 %551 }
 0x216   : > { %v582_v38 = vadd.f32 %v574_v23, %v552_v17 }
 0x217   : > { %1450 = vmatmul.msk.f32.gmra.mxu2 %vm610_vm5, %v608_v30 }
 0x218   : > { %v598_v43 = vadd.f32 %v590_v2, %v582_v38 }
 0x21d   : > { %v561_v61 = vpop.xlane.xlu0 %560  ;;  %v540_v13 = vpop.xlane.xlu1 %539 }
 0x21e   : > { %v585_v0 = vadd.f32 %v577_v59, %v561_v61  ;;  %v578_v50 = vadd.f32 %v570_v46, %v540_v13 }
 0x21f   : > { %1451 = vmatmul.msk.f32.gmra.mxu2 %vm610_vm5, %v609_v35 }
 0x220   : > { %v601_v7 = vadd.f32 %v593_v60, %v585_v0  ;;  %v594_v54 = vadd.f32 %v586_v51, %v578_v50 }
 0x222   : > { %684 = vmatpush.msra.mxu3 %v601_v7 }
 0x225   : > { %v558_v21 = vpop.xlane.xlu0 %557 }
 0x226   : > { %v584_v29 = vadd.f32 %v576_v9, %v558_v21 }
 0x228   : > { %v600_v39 = vadd.f32 %v592_v20, %v584_v29 }
 0x22a   : > { %685 = vmatpush.msra.mxu3 %v600_v39 }
 0x22c   : > { %686 = vmatpush.msra.mxu3 %v599_v10 }
 0x22d   : > { %v543_v44 = vpop.xlane.xlu0 %542 }
 0x22e   : > { %v579_v47 = vadd.f32 %v571_v42, %v543_v44  ;;  %687 = vmatpush.msra.mxu3 %v598_v43 }
 0x230   : > { %688 = vmatpush.msra.mxu3 %v597_v48  ;;  %v595_v45 = vadd.f32 %v587_v18, %v579_v47 }
 0x232   : > { %689 = vmatpush.msra.mxu3 %v596_v55 }
 0x234   : > { %690 = vmatpush.msra.mxu3 %v595_v45 }
 0x236   : > { %691 = vmatpush.msra.mxu3 %v594_v54 }
 0x237   : > { %1452 = vmatmul.msk.f32.vlgmr.msra.gmra.mxu3 %vm610_vm5, %v602_v56 }
 0x23b   : > { %v652_v48 = vpop.f32.mrf.mxu2 }
 0x23c   : > { %v2222_v56 = vmul.f32 0.00390625, %v652_v48 }
 0x23e   : > { %v733_v58 = vmul.f32 %v2222_v56, %v2222_v56 }
 0x23f   : > { %1453 = vmatmul.msk.f32.gmra.mxu3 %vm610_vm5, %v603_v49 }
 0x243   : > { %v655_v55 = vpop.f32.mrf.mxu2 }
 0x244   : > { %v2226_v61 = vmul.f32 0.00390625, %v655_v55 }
 0x246   : > { %v734_v1 = vmul.f32 %v2226_v61, %v2226_v61 }
 0x247   : > { %1454 = vmatmul.msk.f32.gmra.mxu3 %vm610_vm5, %v604_v15 }
 0x24b   : > { %v658_v53 = vpop.f32.mrf.mxu2 }
 0x24c   : > { %v2230_v17 = vmul.f32 0.00390625, %v658_v53 }
 0x24e   : > { %v735_v23 = vmul.f32 %v2230_v17, %v2230_v17 }
 0x24f   : > { %1455 = vmatmul.msk.f32.gmra.mxu3 %vm610_vm5, %v605_v57 }
 0x253   : > { %v661_v12 = vpop.f32.mrf.mxu2 }
 0x254   : > { %v2234_v2 = vmul.f32 0.00390625, %v661_v12 }
 0x256   : > { %v736_v13 = vmul.f32 %v2234_v2, %v2234_v2 }
 0x257   : > { %1456 = vmatmul.msk.f32.gmra.mxu3 %vm610_vm5, %v606_v52 }
 0x25f   : > { %1457 = vmatmul.msk.f32.gmra.mxu3 %vm610_vm5, %v607_v41 }
 0x267   : > { %1458 = vmatmul.msk.f32.gmra.mxu3 %vm610_vm5, %v608_v30 }
 0x26f   : > { %1459 = vmatmul.msk.f32.gmra.mxu3 %vm610_vm5, %v609_v35 }
 0x28a   : > { %v664_v38 = vpop.f32.mrf.mxu2 }
 0x28b   : > { %v2239_v52 = vmul.f32 0.00390625, %v664_v38 }
 0x28d   : > { %v737_v53 = vmul.f32 %v2239_v52, %v2239_v52 }
 0x292   : > { %v667_v41 = vpop.f32.mrf.mxu2 }
 0x2ba   : > { %v693_v59 = vpop.f32.mrf.mxu3 }
 0x2bb   : > { %v725_v49 = vmul.f32 0.00390625, %v693_v59 }
 0x2bd   : > { %v741_v60 = vsub.f32 %v725_v49, %v733_v58 }
 0x2bf   : > { %v749_v62 = vmax.f32 %v741_v60, 0.0 }
 0x2c1   : > { %v757_v0 = vadd.f32 1e-05, %v749_v62 }
 0x2c2   : > { %v696_v7 = vpop.f32.mrf.mxu3 }
 0x2c3   : > { %1645 = vrsqrt.f32 %v757_v0  ;;  %v726_v16 = vmul.f32 0.00390625, %v696_v7  ;;  %vm771_vm7 = vweird.f32 %v757_v0  ;;  %v2244_v7 = vmul.f32 0.00390625, %v667_v41 }
 0x2c5   : > { %v742_v15 = vsub.f32 %v726_v16, %v734_v1 }
 0x2c7   : > { %v750_v9 = vmax.f32 %v742_v15, 0.0 }
 0x2c9   : > { %v1646_v20 = vpop.eup %1645  ;;  %v758_v21 = vadd.f32 1e-05, %v750_v9  ;;  %v670_v9 = vpop.f32.mrf.mxu2 }
 0x2ca   : > { %v766_v24 = vmul.f32 %v1646_v20, %v757_v0  ;;  %v699_v29 = vpop.f32.mrf.mxu3  ;;  %vm772_vm6 = vweird.f32 %v1646_v20 }
 0x2cb   : > { %1647 = vrsqrt.f32 %v758_v21  ;;  %v727_v63 = vmul.f32 0.00390625, %v699_v29  ;;  %vm773_vm8 = vmor %vm771_vm7, %vm772_vm6  ;;  %vm781_vm10 = vweird.f32 %v758_v21 }
 0x2cc   : > { %v767_v32 = vmul.f32 %v1646_v20, %v766_v24 }
 0x2cd   : > { %v743_v39 = vsub.f32 %v727_v63, %v735_v23 }
 0x2ce   : > { %v768_v40 = vmul.f32 0.5, %v767_v32 }
 0x2cf   : > { %v751_v10 = vmax.f32 %v743_v39, 0.0 }
 0x2d0   : > { %v769_v57 = vsub.f32 1.5, %v768_v40 }
 0x2d1   : > { %v1648_v42 = vpop.eup %1647  ;;  %v759_v43 = vadd.f32 1e-05, %v751_v10  ;;  %v2249_v10 = vmul.f32 0.00390625, %v670_v9 }
 0x2d2   : > { %v776_v44 = vmul.f32 %v1648_v42, %v758_v21  ;;  %v702_v46 = vpop.f32.mrf.mxu3  ;;  %v770_v47 = vmul.f32 %v1646_v20, %v769_v57  ;;  %vm782_vm9 = vweird.f32 %v1648_v42  ;;  %v738_v21 = vmul.f32 %v2244_v7, %v2244_v7 }
 0x2d3   : > { %1649 = vrsqrt.f32 %v759_v43  ;;  %v728_v18 = vmul.f32 0.00390625, %v702_v46  ;;  %vm783_vm11 = vmor %vm781_vm10, %vm782_vm9  ;;  %vm791_vm13 = vweird.f32 %v759_v43 }
 0x2d4   : > { %v774_v50 = vsel %vm773_vm8, %v1646_v20, %v770_v47  ;;  %v777_v51 = vmul.f32 %v1648_v42, %v776_v44  ;;  %v739_v47 = vmul.f32 %v2249_v10, %v2249_v10 }
 0x2d5   : > { %v744_v45 = vsub.f32 %v728_v18, %v736_v13  ;;  %853 = vrot.lane.b32.xlu2 %v774_v50, %s1813_s5 }
 0x2d6   : > { %v778_v54 = vmul.f32 0.5, %v777_v51  ;;  %v673_v51 = vpop.f32.mrf.mxu2 }
 0x2d7   : > { %v752_v30 = vmax.f32 %v744_v45, 0.0 }
 0x2d8   : > { %v779_v35 = vsub.f32 1.5, %v778_v54 }
 0x2d9   : > { %v1650_v48 = vpop.eup %1649  ;;  %v760_v55 = vadd.f32 1e-05, %v752_v30 }
 0x2da   : > { %v786_v58 = vmul.f32 %v1650_v48, %v759_v43  ;;  %v705_v59 = vpop.f32.mrf.mxu3  ;;  %v780_v49 = vmul.f32 %v1648_v42, %v779_v35  ;;  %vm792_vm12 = vweird.f32 %v1650_v48  ;;  %v2254_v35 = vmul.f32 0.00390625, %v673_v51 }
 0x2db   : > { %1651 = vrsqrt.f32 %v760_v55  ;;  %v729_v60 = vmul.f32 0.00390625, %v705_v59  ;;  %vm793_vm14 = vmor %vm791_vm13, %vm792_vm12  ;;  %vm801_vm0 = vweird.f32 %v760_v55  ;;  %v1814_v51 = vmov 1  }
 0x2dc   : > { %v784_v62 = vsel %vm783_vm11, %v1648_v42, %v780_v49  ;;  %v787_v0 = vmul.f32 %v1650_v48, %v786_v58  ;;  %1642 = vset.pattern.permute.xlu1 %v1814_v51  ;;  %1643 = vset.pattern.permute.xlu0 %v1814_v51 }
 0x2dd   : > { %v745_v1 = vsub.f32 %v729_v60, %v737_v53  ;;  %855 = vrot.lane.b32.xlu0 %v784_v62, %s1813_s5  ;;  %1644 = vset.pattern.permute.xlu2 %v1814_v51 }
 0x2de   : > { %v788_v12 = vmul.f32 0.5, %v787_v0 }
 0x2df   : > { %v753_v16 = vmax.f32 %v745_v1, 0.0 }
 0x2e0   : > { %v789_v15 = vsub.f32 1.5, %v788_v12 }
 0x2e1   : > { %v1652_v20 = vpop.eup %1651  ;;  %v761_v23 = vadd.f32 1e-05, %v753_v16 }
 0x2e2   : > { %v796_v24 = vmul.f32 %v1652_v20, %v760_v55  ;;  %v708_v29 = vpop.f32.mrf.mxu3  ;;  %v790_v63 = vmul.f32 %v1650_v48, %v789_v15  ;;  %vm802_vm15 = vweird.f32 %v1652_v20  ;;  %v740_v55 = vmul.f32 %v2254_v35, %v2254_v35 }
 0x2e3   : > { %1653 = vrsqrt.f32 %v761_v23  ;;  %v730_v32 = vmul.f32 0.00390625, %v708_v29  ;;  %vm803_vm1 = vmor %vm801_vm0, %vm802_vm15  ;;  %vm811_vm3 = vweird.f32 %v761_v23  ;;  %vm1030_vm15 = vcmask 125952  }
 0x2e4   : > { %v794_v38 = vsel %vm793_vm14, %v1650_v48, %v790_v63  ;;  %v797_v39 = vmul.f32 %v1652_v20, %v796_v24  ;;  %vm973_vm14 = vcmask 7168  }
 0x2e5   : > { %v746_v40 = vsub.f32 %v730_v32, %v738_v21  ;;  %857 = vrot.lane.b32.xlu1 %v794_v38, %s1813_s5 }
 0x2e6   : > { %v798_v57 = vmul.f32 0.5, %v797_v39 }
 0x2e7   : > { %v754_v42 = vmax.f32 %v746_v40, 0.0 }
 0x2e8   : > { %v799_v13 = vsub.f32 1.5, %v798_v57 }
 0x2e9   : > { %v1654_v44 = vpop.eup %1653  ;;  %v762_v46 = vadd.f32 1e-05, %v754_v42 }
 0x2ea   : > { %v806_v43 = vmul.f32 %v1654_v44, %v761_v23  ;;  %v711_v18 = vpop.f32.mrf.mxu3  ;;  %v800_v50 = vmul.f32 %v1652_v20, %v799_v13  ;;  %vm812_vm2 = vweird.f32 %v1654_v44 }
 0x2eb   : > { %1655 = vrsqrt.f32 %v762_v46  ;;  %v731_v45 = vmul.f32 0.00390625, %v711_v18  ;;  %vm813_vm4 = vmor %vm811_vm3, %vm812_vm2  ;;  %vm821_vm6 = vweird.f32 %v762_v46 }
 0x2ec   : > { %v804_v54 = vsel %vm803_vm1, %v1652_v20, %v800_v50  ;;  %v807_v41 = vmul.f32 %v1654_v44, %v806_v43 }
 0x2ed   : > { %v747_v30 = vsub.f32 %v731_v45, %v739_v47  ;;  %859 = vrot.lane.b32.xlu2 %v804_v54, %s1813_s5  ;;  %v2272_v45 = vpop.permute.xlu2 %943 }
 0x2ee   : > { %v808_v48 = vmul.f32 0.5, %v807_v41 }
 0x2ef   : > { %v755_v53 = vmax.f32 %v747_v30, 0.0  ;;  %v942_v30 = vpop.permute.xlu0 %941 }
 0x2f0   : > { %v809_v58 = vsub.f32 1.5, %v808_v48  ;;  %v2276_v48 = vpop.permute.xlu1 %945 }
 0x2f1   : > { %v1656_v59 = vpop.eup %1655  ;;  %v763_v49 = vadd.f32 1e-05, %v755_v53 }
 0x2f2   : > { %v816_v60 = vmul.f32 %v1656_v59, %v762_v46  ;;  %v714_v62 = vpop.f32.mrf.mxu3  ;;  %v810_v0 = vmul.f32 %v1654_v44, %v809_v58  ;;  %vm822_vm5 = vweird.f32 %v1656_v59 }
 0x2f3   : > { %1657 = vrsqrt.f32 %v763_v49  ;;  %v732_v1 = vmul.f32 0.00390625, %v714_v62  ;;  %vm823_vm7 = vmor %vm821_vm6, %vm822_vm5  ;;  %vm831_vm9 = vweird.f32 %v763_v49 }
 0x2f4   : > { %v814_v12 = vsel %vm813_vm4, %v1654_v44, %v810_v0  ;;  %v817_v16 = vmul.f32 %v1656_v59, %v816_v60 }
 0x2f5   : > { %v748_v15 = vsub.f32 %v732_v1, %v740_v55  ;;  %861 = vrot.lane.b32.xlu0 %v814_v12, %s1813_s5 }
 0x2f6   : > { %v818_v9 = vmul.f32 0.5, %v817_v16 }
 0x2f7   : > { %v756_v20 = vmax.f32 %v748_v15, 0.0 }
 0x2f8   : > { %v819_v21 = vsub.f32 1.5, %v818_v9 }
 0x2f9   : > { %v1658_v24 = vpop.eup %1657  ;;  %v764_v29 = vadd.f32 1e-05, %v756_v20 }
 0x2fa   : > { %v826_v63 = vmul.f32 %v1658_v24, %v763_v49  ;;  %v820_v32 = vmul.f32 %v1656_v59, %v819_v21  ;;  %vm832_vm8 = vweird.f32 %v1658_v24 }
 0x2fb   : > { %1659 = vrsqrt.f32 %v764_v29  ;;  %vm833_vm10 = vmor %vm831_vm9, %vm832_vm8  ;;  %vm841_vm12 = vweird.f32 %v764_v29 }
 0x2fc   : > { %v824_v23 = vsel %vm823_vm7, %v1656_v59, %v820_v32  ;;  %v827_v38 = vmul.f32 %v1658_v24, %v826_v63 }
 0x2fd   : > { %863 = vrot.lane.b32.xlu2 %v824_v23, %s1813_s5 }
 0x2fe   : > { %v828_v39 = vmul.f32 0.5, %v827_v38 }
 0x300   : > { %v829_v40 = vsub.f32 1.5, %v828_v39 }
 0x301   : > { %v1660_v57 = vpop.eup %1659 }
 0x302   : > { %v836_v42 = vmul.f32 %v1660_v57, %v764_v29  ;;  %v830_v13 = vmul.f32 %v1658_v24, %v829_v40  ;;  %vm842_vm11 = vweird.f32 %v1660_v57  ;;  %v885_v29 = vsub.f32 %v2136_v27, %v2222_v56 }
 0x303   : > { %vm843_vm13 = vmor %vm841_vm12, %vm842_vm11 }
 0x304   : > { %v834_v44 = vsel %vm833_vm10, %v1658_v24, %v830_v13  ;;  %v837_v47 = vmul.f32 %v1660_v57, %v836_v42 }
 0x305   : > { %865 = vrot.lane.b32.xlu1 %v834_v44, %s1813_s5  ;;  %949 = vrot.lane.b32.xlu2 %v2101_v11, %s1812_s12 }
 0x306   : > { %v838_v46 = vmul.f32 0.5, %v837_v47 }
 0x308   : > { %v839_v43 = vsub.f32 1.5, %v838_v46 }
 0x30a   : > { %v840_v18 = vmul.f32 %v1660_v57, %v839_v43 }
 0x30c   : > { %v844_v50 = vsel %vm843_vm13, %v1660_v57, %v840_v18 }
 0x30d   : > { %867 = vrot.lane.b32.xlu0 %v844_v50, %s1813_s5  ;;  %955 = vrot.lane.b32.xlu2 %v2086_v6, %s1812_s12 }
 0x30e   : > { %951 = vrot.lane.b32.xlu1 %v2092_v8, %s1812_s12 }
 0x315   : > { %947 = vrot.lane.b32.xlu0 %v2110_v14, %s1812_s12 }
 0x31d   : > { %953 = vrot.lane.b32.xlu0 %v2081_v4, %s1812_s12 }
 0x32f   : > { %v854_v54 = vpop.permute.xlu2 %853 }
 0x330   : > { %v877_v41 = vmul.f32 %v854_v54, %v2136_v27  ;;  %v888_v27 = vsub.f32 %v2110_v14, %v2234_v2 }
 0x332   : > { %901 = vrot.lane.b32.xlu2 %v877_v41, %s1815_s3  ;;  %983 = vperm.xlu1 %1642, %v877_v41  }
 0x347   : > { %v860_v59 = vpop.permute.xlu2 %859 }
 0x348   : > { %v880_v55 = vmul.f32 %v860_v59, %v2110_v14 }
 0x34f   : > { %v856_v53 = vpop.permute.xlu0 %855 }
 0x350   : > { %v878_v58 = vmul.f32 %v856_v53, %v2128_v22 }
 0x352   : > { %903 = vrot.lane.b32.xlu1 %v878_v58, %s1815_s3  ;;  %987 = vperm.xlu0 %1643, %v878_v58  }
 0x357   : > { %v858_v49 = vpop.permute.xlu1 %857  ;;  %v864_v62 = vpop.permute.xlu2 %863 }
 0x358   : > { %v879_v60 = vmul.f32 %v858_v49, %v2120_v19  ;;  %v882_v0 = vmul.f32 %v864_v62, %v2092_v8 }
 0x35a   : > { %991 = vperm.xlu2 %1644, %v879_v60   ;;  %995 = vperm.xlu1 %1642, %v880_v55  }
 0x35b   : > { %905 = vrot.lane.b32.xlu0 %v879_v60, %s1815_s3  ;;  %v890_v60 = vsub.f32 %v2092_v8, %v2244_v7 }
 0x35f   : > { %v2289_v9 = vpop.permute.xlu2 %949 }
 0x362   : > { %907 = vrot.lane.b32.xlu2 %v880_v55, %s1815_s3 }
 0x363   : > { %911 = vrot.lane.b32.xlu0 %v882_v0, %s1815_s3 }
 0x367   : > { %v862_v1 = vpop.permute.xlu0 %861  ;;  %v2294_v24 = vpop.permute.xlu2 %955 }
 0x368   : > { %v881_v12 = vmul.f32 %v862_v1, %v2101_v11 }
 0x36a   : > { %999 = vperm.xlu2 %1644, %v881_v12   ;;  %909 = vrot.lane.b32.xlu1 %v881_v12, %s1815_s3 }
 0x377   : > { %v866_v16 = vpop.permute.xlu1 %865 }
 0x378   : > { %v883_v15 = vmul.f32 %v866_v16, %v2081_v4 }
 0x37a   : > { %913 = vrot.lane.b32.xlu2 %v883_v15, %s1815_s3  ;;  %1007 = vperm.xlu0 %1643, %v883_v15  }
 0x37f   : > { %v868_v20 = vpop.permute.xlu0 %867 }
 0x380   : > { %v884_v21 = vmul.f32 %v868_v20, %v2086_v6  ;;  %v952_v38 = vpop.permute.xlu1 %951 }
 0x382   : > { %1011 = vperm.xlu2 %1644, %v884_v21   ;;  %915 = vrot.lane.b32.xlu1 %v884_v21, %s1815_s3 }
 0x387   : > { %v948_v42 = vpop.permute.xlu0 %947 }
 0x38a   : > { %1003 = vperm.xlu1 %1642, %v882_v0  }
 0x38c   : > { %v902_v63 = vpop.permute.xlu2 %901 }
 0x38d   : > { %v925_v32 = vmul.f32 %v902_v63, %v885_v29 }
 0x38f   : > { %v965_v23 = vadd.f32 %v942_v30, %v925_v32  ;;  %v954_v56 = vpop.permute.xlu0 %953 }
 0x391   : > { %974 = vst.msk [vmem:[#allocation4] sm:$0xff] %vm973_vm14, %v965_v23 }
 0x3a4   : > { %v984_v39 = vpop.permute.xlu1 %983 }
 0x3a5   : > { %v1014_v40 = vmul.f32 %v1995_v25, %v984_v39  ;;  %v886_v25 = vsub.f32 %v2128_v22, %v2226_v61  ;;  %v887_v22 = vsub.f32 %v2120_v19, %v2230_v17 }
 0x3a7   : > { %v1022_v57 = vpack.c.bf16 %v1014_v40, %v1014_v40 }
 0x3a9   : > { %1031 = vst.msk [vmem:[#allocation5] sm:$0xf] %vm1030_vm15, %v1022_v57 }
 0x3b4   : > { %v992_v13 = vpop.permute.xlu2 %991 }
 0x3b5   : > { %v1016_v44 = vmul.f32 %v2006_v28, %v992_v13 }
 0x3b7   : > { %v1024_v47 = vpack.c.bf16 %v1016_v44, %v1016_v44 }
 0x3b9   : > { %1033 = vst.msk [vmem:[#allocation5 + $0x8] sm:$0xf] %vm1030_vm15, %v1024_v47 }
 0x3bc   : > { %v908_v46 = vpop.permute.xlu2 %907 }
 0x3bd   : > { %v928_v43 = vmul.f32 %v908_v46, %v888_v27 }
 0x3bf   : > { %v968_v18 = vadd.f32 %v948_v42, %v928_v43 }
 0x3c1   : > { %977 = vst.msk [vmem:[#allocation4 + $0x18] sm:$0xff] %vm973_vm14, %v968_v18 }
 0x3c4   : > { %v1000_v50 = vpop.permute.xlu2 %999  ;;  %v904_v51 = vpop.permute.xlu1 %903 }
 0x3c5   : > { %v1018_v54 = vmul.f32 %v2019_v33, %v1000_v50  ;;  %v926_v28 = vmul.f32 %v904_v51, %v886_v25  ;;  %v988_v41 = vpop.permute.xlu0 %987 }
 0x3c6   : > { %v1015_v30 = vmul.f32 %v1999_v26, %v988_v41 }
 0x3c7   : > { %v1026_v53 = vpack.c.bf16 %v1018_v54, %v1018_v54  ;;  %v966_v14 = vadd.f32 %v2272_v45, %v926_v28  ;;  %v891_v45 = vsub.f32 %v2081_v4, %v2249_v10 }
 0x3c8   : > { %v1023_v2 = vpack.c.bf16 %v1015_v30, %v1015_v30 }
 0x3c9   : > { %1035 = vst.msk [vmem:[#allocation5 + $0x10] sm:$0xf] %vm1030_vm15, %v1026_v53 }
 0x3ca   : > { %975 = vst.msk [vmem:[#allocation4 + $0x8] sm:$0xff] %vm973_vm14, %v966_v14 }
 0x3cb   : > { %1032 = vst.msk [vmem:[#allocation5 + $0x4] sm:$0xf] %vm1030_vm15, %v1023_v2 }
 0x3cc   : > { %v996_v58 = vpop.permute.xlu1 %995 }
 0x3cd   : > { %v1017_v33 = vmul.f32 %v2010_v31, %v996_v58  ;;  %v906_v61 = vpop.permute.xlu0 %905 }
 0x3ce   : > { %v927_v59 = vmul.f32 %v906_v61, %v887_v22 }
 0x3cf   : > { %v1025_v49 = vpack.c.bf16 %v1017_v33, %v1017_v33 }
 0x3d0   : > { %v967_v26 = vadd.f32 %v2276_v48, %v927_v59  ;;  %v889_v48 = vsub.f32 %v2101_v11, %v2239_v52  ;;  %v892_v11 = vsub.f32 %v2086_v6, %v2254_v35 }
 0x3d1   : > { %1034 = vst.msk [vmem:[#allocation5 + $0xc] sm:$0xf] %vm1030_vm15, %v1025_v49 }
 0x3d2   : > { %976 = vst.msk [vmem:[#allocation4 + $0x10] sm:$0xff] %vm973_vm14, %v967_v26 }
 0x3d4   : > { %v914_v55 = vpop.permute.xlu2 %913 }
 0x3d5   : > { %v931_v62 = vmul.f32 %v914_v55, %v891_v45  ;;  %v912_v19 = vpop.permute.xlu0 %911 }
 0x3d6   : > { %v930_v17 = vmul.f32 %v912_v19, %v890_v60 }
 0x3d7   : > { %v971_v31 = vadd.f32 %v954_v56, %v931_v62 }
 0x3d8   : > { %v970_v0 = vadd.f32 %v952_v38, %v930_v17 }
 0x3d9   : > { %980 = vst.msk [vmem:[#allocation4 + $0x30] sm:$0xff] %vm973_vm14, %v971_v31 }
 0x3da   : > { %979 = vst.msk [vmem:[#allocation4 + $0x28] sm:$0xff] %vm973_vm14, %v970_v0 }
 0x3dc   : > { %v910_v1 = vpop.permute.xlu1 %909  ;;  %v1012_v12 = vpop.permute.xlu2 %1011 }
 0x3dd   : > { %v929_v16 = vmul.f32 %v910_v1, %v889_v48  ;;  %v1021_v4 = vmul.f32 %v2040_v37, %v1012_v12 }
 0x3df   : > { %v969_v10 = vadd.f32 %v2289_v9, %v929_v16  ;;  %v1029_v8 = vpack.c.bf16 %v1021_v4, %v1021_v4 }
 0x3e1   : > { %978 = vst.msk [vmem:[#allocation4 + $0x20] sm:$0xff] %vm973_vm14, %v969_v10 }
 0x3e2   : > { %1038 = vst.msk [vmem:[#allocation5 + $0x1c] sm:$0xf] %vm1030_vm15, %v1029_v8 }
 0x3ec   : > { %v1008_v7 = vpop.permute.xlu0 %1007 }
 0x3ed   : > { %v1020_v15 = vmul.f32 %v2034_v36, %v1008_v7 }
 0x3ef   : > { %v1028_v20 = vpack.c.bf16 %v1020_v15, %v1020_v15 }
 0x3f1   : > { %1037 = vst.msk [vmem:[#allocation5 + $0x18] sm:$0xf] %vm1030_vm15, %v1028_v20 }
 0x3f4   : > { %v916_v52 = vpop.permute.xlu1 %915 }
 0x3f5   : > { %v932_v21 = vmul.f32 %v916_v52, %v892_v11 }
 0x3f7   : > { %v972_v37 = vadd.f32 %v2294_v24, %v932_v21 }
 0x3f9   : > { %981 = vst.msk [vmem:[#allocation4 + $0x38] sm:$0xff] %vm973_vm14, %v972_v37 }
 0x3fc   : > { %v1004_v9 = vpop.permute.xlu1 %1003 }
 0x3fd   : > { %v1019_v29 = vmul.f32 %v2025_v34, %v1004_v9 }
 0x3ff   : > { %v1027_v63 = vpack.c.bf16 %v1019_v29, %v1019_v29 }
 0x401   : > { %1036 = vst.msk [vmem:[#allocation5 + $0x14] sm:$0xf] %vm1030_vm15, %v1027_v63 }
 0x402 PF: > { %p1460_p12 = scmp.ne.s32.totalorder %s1790_s24, 1 }
 0x404   : > { %1041 = sbr.rel (%p1460_p12) target bundleno = 1364 (0x554), region = 101 }
 0x409   : > { %v1480_v36 = vor.u32 %v1976_v5, %v1974_v3  ;;  %v1053_v6 = vld [vmem:[#allocation4 + $0x18] sm:$0xff]  ;;  %v1816_v35 = vmov 0   ;;  %v1494_v32 = vld [vmem:[#allocation5] sm:$0xff]  ;;  %v1495_v24 = vld [vmem:[#allocation5 + $0x8] sm:$0xff]  ;;  %vm1124_vm0 = vcmask 130048   ;;  %vm1239_vm1 = vcmask 261120  }
 0x40a   : > { %1661 = vset.pattern.permute.xlu0 %v1816_v35  ;;  %1662 = vset.pattern.permute.xlu1 %v1816_v35  ;;  %v1051_v23 = vld [vmem:[#allocation4 + $0x8] sm:$0xff]  ;;  %v1497_v34 = vld [vmem:[#allocation5 + $0x18] sm:$0xff]  ;;  %v1052_v3 = vld [vmem:[#allocation4 + $0x10] sm:$0xff] }
 0x40b   : > { %1144 = vmatpush.bf16.msra.mxu0 %v1480_v36  ;;  %1528 = vmatpush.bf16.msra.mxu1 %v1480_v36  ;;  %v1050_v5 = vld [vmem:[#allocation4] sm:$0xff]  ;;  %v1056_v38 = vld [vmem:[#allocation4 + $0x30] sm:$0xff]  ;;  %v1057_v39 = vld [vmem:[#allocation4 + $0x38] sm:$0xff] }
 0x40c   : > { %1530 = vmatpush.bf16.msra.mxu3 %v1480_v36  ;;  %1075 = vperm.xlu0 %1661, %v1053_v6   ;;  %v1496_v40 = vld [vmem:[#allocation5 + $0x10] sm:$0xff]  ;;  %v1054_v54 = vld [vmem:[#allocation4 + $0x20] sm:$0xff]  ;;  %v1055_v59 = vld [vmem:[#allocation4 + $0x28] sm:$0xff] }
 0x40d   : > { %1065 = vperm.xlu1 %1662, %v1051_v23   ;;  %1529 = vmatpush.bf16.msra.mxu2 %v1480_v36  ;;  %v1238_v29 = vld [vmem:[%s310_s21] sm:$0x1] }
 0x40e   : > { %1481 = vmatmul.msk.bf16.vlgmr.msra.gmra.mxu0 %vm1124_vm0, %v1494_v32  ;;  %1482 = vmatmul.msk.bf16.vlgmr.msra.gmra.mxu1 %vm1124_vm0, %v1495_v24 }
 0x40f   : > { %1484 = vmatmul.msk.bf16.vlgmr.msra.gmra.mxu3 %vm1124_vm0, %v1497_v34  ;;  %1663 = vset.pattern.permute.xlu2 %v1816_v35 }
 0x410   : > { %1483 = vmatmul.msk.bf16.vlgmr.msra.gmra.mxu2 %vm1124_vm0, %v1496_v40  ;;  %1080 = vperm.xlu2 %1663, %v1054_v54  }
 0x414   : > { %1070 = vperm.xlu0 %1661, %v1052_v3  }
 0x415   : > { %1060 = vperm.xlu1 %1662, %v1050_v5  }
 0x418   : > { %1085 = vperm.xlu2 %1663, %v1055_v59  }
 0x41c   : > { %1090 = vperm.xlu0 %1661, %v1056_v38  }
 0x41d   : > { %1095 = vperm.xlu1 %1662, %v1057_v39  }
 0x46a   : > { %v1081_v36 = vpop.permute.xlu2 %1080 }
 0x472   : > { %v1086_v34 = vpop.permute.xlu2 %1085 }
 0x47e   : > { %v1076_v57 = vpop.permute.xlu0 %1075 }
 0x47f   : > { %v1066_v42 = vpop.permute.xlu1 %1065 }
 0x486   : > { %v1071_v13 = vpop.permute.xlu0 %1070 }
 0x487   : > { %v1061_v44 = vpop.permute.xlu1 %1060 }
 0x48b   : > { %v1146_v47 = vpop.f32.mrf.mxu0  ;;  %v1151_v27 = vpop.f32.mrf.mxu1 }
 0x48c   : > { %v1147_v56 = vadd.f32 %v1146_v47, %v1061_v44  ;;  %v1152_v46 = vadd.f32 %v1151_v27, %v1071_v13 }
 0x48e   : > { %v1166_v43 = vmul.f32 %v1147_v56, %v1147_v56  ;;  %v1168_v18 = vmul.f32 %v1152_v46, %v1152_v46  ;;  %v1184_v7 = vmul.f32 0.5, %v1152_v46  ;;  %v1182_v37 = vmul.f32 0.5, %v1147_v56  ;;  %v1091_v32 = vpop.permute.xlu0 %1090 }
 0x48f   : > { %v1096_v24 = vpop.permute.xlu1 %1095 }
 0x490   : > { %v1176_v25 = vmul.f32 %v1168_v18, %v1152_v46  ;;  %v1174_v50 = vmul.f32 %v1166_v43, %v1147_v56 }
 0x492   : > { %v1192_v51 = vmul.f32 0.044715, %v1176_v25  ;;  %v1190_v22 = vmul.f32 0.044715, %v1174_v50  ;;  %v1161_v63 = vpop.f32.mrf.mxu3 }
 0x493   : > { %v1148_v28 = vpop.f32.mrf.mxu0  ;;  %v1153_v41 = vpop.f32.mrf.mxu1  ;;  %v1162_v23 = vadd.f32 %v1161_v63, %v1091_v32 }
 0x494   : > { %v1149_v30 = vadd.f32 %v1148_v28, %v1066_v42  ;;  %v1154_v53 = vadd.f32 %v1153_v41, %v1076_v57  ;;  %v1200_v58 = vadd.f32 %v1192_v51, %v1152_v46  ;;  %v1198_v55 = vadd.f32 %v1190_v22, %v1147_v56  ;;  %v1156_v6 = vpop.f32.mrf.mxu2 }
 0x495   : > { %v1157_v38 = vadd.f32 %v1156_v6, %v1081_v36  ;;  %v1172_v40 = vmul.f32 %v1162_v23, %v1162_v23 }
 0x496   : > { %v1167_v14 = vmul.f32 %v1149_v30, %v1149_v30  ;;  %v1169_v2 = vmul.f32 %v1154_v53, %v1154_v53  ;;  %v1208_v26 = vmul.f32 0.7978846, %v1200_v58  ;;  %v1206_v31 = vmul.f32 0.7978846, %v1198_v55 }
 0x497   : > { %v1185_v12 = vmul.f32 0.5, %v1154_v53  ;;  %v1183_v11 = vmul.f32 0.5, %v1149_v30  ;;  %v1170_v42 = vmul.f32 %v1157_v38, %v1157_v38  ;;  %v1180_v44 = vmul.f32 %v1172_v40, %v1162_v23 }
 0x498   : > { %v1175_v33 = vmul.f32 %v1167_v14, %v1149_v30  ;;  %v1177_v61 = vmul.f32 %v1169_v2, %v1154_v53  ;;  %1664 = vtanh.f32 %v1208_v26 }
 0x499   : > { %v1178_v27 = vmul.f32 %v1170_v42, %v1157_v38  ;;  %v1196_v43 = vmul.f32 0.044715, %v1180_v44 }
 0x49a   : > { %v1193_v49 = vmul.f32 0.044715, %v1177_v61  ;;  %v1191_v45 = vmul.f32 0.044715, %v1175_v33  ;;  %v1163_v35 = vpop.f32.mrf.mxu3 }
 0x49b   : > { %v1164_v5 = vadd.f32 %v1163_v35, %v1096_v24  ;;  %v1194_v50 = vmul.f32 0.044715, %v1178_v27  ;;  %v1204_v54 = vadd.f32 %v1196_v43, %v1162_v23 }
 0x49c   : > { %v1201_v60 = vadd.f32 %v1193_v49, %v1154_v53  ;;  %v1199_v62 = vadd.f32 %v1191_v45, %v1149_v30  ;;  %v1158_v3 = vpop.f32.mrf.mxu2 }
 0x49d   : > { %v1159_v39 = vadd.f32 %v1158_v3, %v1086_v34  ;;  %v1173_v57 = vmul.f32 %v1164_v5, %v1164_v5  ;;  %v1202_v41 = vadd.f32 %v1194_v50, %v1157_v38  ;;  %v1212_v14 = vmul.f32 0.7978846, %v1204_v54 }
 0x49e   : > { %v1209_v19 = vmul.f32 0.7978846, %v1201_v60  ;;  %v1207_v17 = vmul.f32 0.7978846, %v1199_v62  ;;  %v1665_v0 = vpop.eup %1664 }
 0x49f   : > { %v1224_v4 = vadd.f32 1.0, %v1665_v0  ;;  %v1171_v13 = vmul.f32 %v1159_v39, %v1159_v39  ;;  %v1181_v47 = vmul.f32 %v1173_v57, %v1164_v5  ;;  %v1210_v22 = vmul.f32 0.7978846, %v1202_v41 }
 0x4a0   : > { %1666 = vtanh.f32 %v1209_v19 }
 0x4a1   : > { %1668 = vtanh.f32 %v1207_v17  ;;  %v1232_v20 = vmul.f32 %v1224_v4, %v1184_v7  ;;  %v1179_v56 = vmul.f32 %v1171_v13, %v1159_v39  ;;  %v1197_v25 = vmul.f32 0.044715, %v1181_v47 }
 0x4a2   : > { %1670 = vtanh.f32 %v1206_v31  ;;  %v1189_v7 = vmul.f32 0.5, %v1164_v5 }
 0x4a3   : > { %v1195_v51 = vmul.f32 0.044715, %v1179_v56  ;;  %v1205_v28 = vadd.f32 %v1197_v25, %v1164_v5 }
 0x4a5   : > { %v1203_v30 = vadd.f32 %v1195_v51, %v1159_v39  ;;  %v1213_v2 = vmul.f32 0.7978846, %v1205_v28 }
 0x4a6   : > { %v1667_v48 = vpop.eup %1666 }
 0x4a7   : > { %v1669_v1 = vpop.eup %1668  ;;  %v1225_v16 = vadd.f32 1.0, %v1667_v48  ;;  %v1211_v33 = vmul.f32 0.7978846, %v1203_v30  ;;  %v1186_v48 = vmul.f32 0.5, %v1157_v38 }
 0x4a8   : > { %v1671_v10 = vpop.eup %1670  ;;  %v1223_v15 = vadd.f32 1.0, %v1669_v1  ;;  %v1187_v1 = vmul.f32 0.5, %v1159_v39 }
 0x4a9   : > { %v1233_v8 = vmul.f32 %v1225_v16, %v1185_v12  ;;  %v1222_v52 = vadd.f32 1.0, %v1671_v10  ;;  %v1188_v10 = vmul.f32 0.5, %v1162_v23 }
 0x4aa   : > { %v1231_v21 = vmul.f32 %v1223_v15, %v1183_v11 }
 0x4ab   : > { %1255 = vmatpush.msrb.mxu1 %v1233_v8  ;;  %v1230_v9 = vmul.f32 %v1222_v52, %v1182_v37 }
 0x4ad   : > { %1256 = vmatpush.msrb.mxu1 %v1232_v20 }
 0x4af   : > { %1257 = vmatpush.msrb.mxu1 %v1231_v21 }
 0x4b1   : > { %1258 = vmatpush.msrb.mxu1 %v1230_v9 }
 0x4b2   : > { %1485 = vmatmul.msk.f32.vlgmr.msrb.gmra.mxu1 %vm1239_vm1, %v1238_v29 }
 0x52f   : > { %v1260_v46 = vpop.f32.mrf.mxu1 }
 0x530   : > { %v1486_v18 = vmul.f32 -1.442695, %v1260_v46 }
 0x532   : > { %1672 = vpow2.f32 %v1486_v18 }
 0x538   : > { %v1673_v53 = vpop.eup %1672 }
 0x539   : > { %v1266_v58 = vadd.f32 1.0, %v1673_v53 }
 0x53b   : > { %1674 = vrcp.f32 %v1266_v58  ;;  %v1278_v62 = vand.u32 2147483648, %v1266_v58  ;;  %v1276_v17 = vand.u32 2147483647, %v1266_v58  ;;  %vm1272_vm3 = vweird.f32 %v1266_v58 }
 0x53c   : > { %1676 = vtanh.f32 %v1212_v14 }
 0x53d   : > { %1678 = vtanh.f32 %v1213_v2  ;;  %v1279_v8 = vor.u32 1.1754944e-38, %v1278_v62  ;;  %vm1277_vm5 = vcmp.eq.f32.partialorder %v1276_v17, 8.507059e+37 }
 0x53e   : > { %1680 = vtanh.f32 %v1210_v22 }
 0x53f   : > { %1682 = vtanh.f32 %v1211_v33 }
 0x541   : > { %v1675_v61 = vpop.eup %1674 }
 0x542   : > { %v1677_v59 = vpop.eup %1676  ;;  %v1268_v49 = vmul.f32 %v1675_v61, %v1266_v58  ;;  %vm1273_vm2 = vweird.f32 %v1675_v61 }
 0x543   : > { %v1679_v26 = vpop.eup %1678  ;;  %v1228_v31 = vadd.f32 1.0, %v1677_v59  ;;  %vm1274_vm4 = vmor %vm1272_vm3, %vm1273_vm2 }
 0x544   : > { %v1681_v45 = vpop.eup %1680  ;;  %v1269_v55 = vsub.f32 1.0, %v1268_v49  ;;  %v1229_v0 = vadd.f32 1.0, %v1679_v26 }
 0x545   : > { %v1683_v60 = vpop.eup %1682  ;;  %v1226_v12 = vadd.f32 1.0, %v1681_v45  ;;  %v1236_v20 = vmul.f32 %v1228_v31, %v1188_v10 }
 0x546   : > { %v1270_v19 = vmul.f32 %v1675_v61, %v1269_v55  ;;  %v1227_v16 = vadd.f32 1.0, %v1683_v60  ;;  %v1237_v52 = vmul.f32 %v1229_v0, %v1189_v7 }
 0x547   : > { %v1234_v21 = vmul.f32 %v1226_v12, %v1186_v48 }
 0x548   : > { %v1271_v4 = vadd.f32 %v1675_v61, %v1270_v19  ;;  %v1235_v37 = vmul.f32 %v1227_v16, %v1187_v1 }
 0x54a   : > { %v1275_v15 = vsel %vm1274_vm4, %v1675_v61, %v1271_v4 }
 0x54b   : > { %v1280_v11 = vsel %vm1277_vm5, %v1279_v8, %v1275_v15 }
 0x54c   : > { %v1282_v9 = vperm.slane %v1280_v11, 0 }
 0x54e   : > { %v1283_v29 = vmul.f32 %v1282_v9, %v1234_v21  ;;  %v1284_v63 = vmul.f32 %v1282_v9, %v1235_v37  ;;  %v1285_v36 = vmul.f32 %v1282_v9, %v1236_v20  ;;  %v1286_v6 = vmul.f32 %v1282_v9, %v1237_v52 }
 0x550   : > { %v1517_v35 = vpack.c.bf16 %v1284_v63, %v1283_v29  ;;  %v1522_v32 = vpack.c.bf16 %v1286_v6, %v1285_v36 }
 0x552   : > { %1518 = vst [vmem:[%s1985_s10] sm:$0xff] %v1517_v35  }
 0x553   : > { %1527 = vst [vmem:[%s1985_s10 + $0x8] sm:$0xff] %v1522_v32  }
 0x554 PF: > { %s1303_s14 = smul.u32 %s1786_s23, %s1790_s24  ;;  %s1488_s21 = sshll.u32 %s1794_s25, 3 }
 0x555   : > { %s1310_s27 = sshll.u32 %s1985_s10, 4  ;;  %s2442_s17 = sld [smem:[#allocation17_spill]]  ;;  %s1311_s27 = int_to_ptr.vmem [resolvable:$true] %s1310_s27 }
 0x556   : > { %s1307_s12 = sadd.s32 %s1488_s21, %s1303_s14  ;;  %s2443_s1 = sand.u32 1, %s1770_s19  }
 0x557   : > { %s1489_s5 = sshll.u32 %s1307_s12, 2  ;;  %s1296_s2 = scalar_lea.sflag [#allocation8], %s2443_s1 }
 0x55b   : > { %s1309_s6 = scalar_lea.hbm %s2442_s17, %s1489_s5  ;;  %s1704_s25 = scalar_lea.hbm %s2442_s17, 64 }
 0x55c   : > { %s1312_s0 = sshll.u32 %s1309_s6, 4  ;;  %s1313_s0 = int_to_ptr.hbm [resolvable:$true] %s1312_s0 }
 0x55d   : > { %s1698_s4 = sshra.s32 %s1313_s0, 4  ;;  %s1699_s4 = int_to_ptr.hbm [resolvable:$true] %s1698_s4 }
 0x55e   : > { %s1700_s15 = scalar_lea.hbm %s1699_s4, 16  ;;  %p1705_p3 = scmp.lt.s32.totalorder %s1699_s4, %s2442_s17 }
 0x55f   : > { %p1701_p0 = scmp.ne.s32.totalorder %s1699_s4, %s1700_s15  ;;  %p1706_p4 = scmp.lt.s32.totalorder %s1704_s25, %s1700_s15 }
 0x561   : > { %p1702_p1 = pnand %p1701_p0, %p1941_p9  ;;  %p1707_p5 = por %p1706_p4, %p1705_p3 }
 0x563   : > { %p1703_p2 = pneg %p1702_p1 }
 0x565   : > { %p1708_p6 = pnand %p1707_p5, %p1703_p2 }
 0x567   : > { %1711 = shalt.err (!%p1708_p6)
}
 0x568   : > { %s1817_s1 = smov 64   ;;  %s1818_s6 = smov 128  }
 0x569   : > { %s1819_s21 = smov 4  }
 0x56a   : > { %1531 = dma.vmem_to_hbm [thread:$0]  (%p1941_p9), %s1311_s27, 256, %s1313_s0, %s1296_s2, %s1817_s1, %s1818_s6, %s1819_s21  }
 0x56b PF: > { %p1537_p7 = scmp.ge.s32.totalorder %s1810_s29, 2  ;;  %s1327_s12 = sand.u32 1, %s1766_s18  }
 0x56c   : > { %s1328_s4 = scalar_lea.sflag [#allocation8], %s1327_s12 }
 0x56d   : > { %p1534_p8 = pnand %p1537_p7, %p1948_p13 }
 0x56f   : > { %p1535_p10 = pneg %p1534_p8 }
 0x571   : > { %1761 = dma.done.wait (%p1535_p10), %s1328_s4, 256  }
 0x572   : > { %1763 = vsyncadd (%p1535_p10), %s1328_s4, 4294967040  ;;  %s18_s29 = sadd.s32 1, %s1810_s29   ;;  %s2444_s24 = sld [smem:[#allocation10_spill]] }
 0x573   : > { %p15_p11 = scmp.ge.s32.totalorder %s18_s29, 10   ;;  %s2445_s27 = sld [smem:[#allocation11_spill]] }
 0x574   : > { %s2446_s18 = smov %s1770_s19  ;;  %s2447_s19 = smov %s1774_s20 }
 0x575   : > { %s2448_s20 = smov %s1956_s13  ;;  %s2449_s21 = smov %s1782_s22 }
 0x576   : > { %s2450_s22 = smov %s1953_s30  ;;  %s2451_s23 = smov %s1798_s26 }
 0x577   : > { %s2452_s25 = smov %s1806_s28  ;;  %s2453_s26 = smov %s2456_s7 }
 0x578   : > { %s2454_s28 = smov %s2464_s9  ;;  %17 = sbr.rel (!%p15_p11) target bundleno = 14 (0xe), region = 144 }
 0x57d   :  { %1334 = vsyncpa [#allocation8], 1 }
 0x57e   :  { %1336 = vsyncpa [#allocation8 + $0x1], 1 }

</bundles_post_ra>
